<compile_context>
chip_gen: v7x
topology: tpu7x:2x2x1
jax: 0.10.0
libtpu: 0.0.40
codegen_flags: <defaults>
</compile_context>

<pallas_src>
import functools

import jax
import jax.numpy as jnp
from jax.experimental import pallas as pl
from jax.experimental.pallas import tpu as pltpu

IN_C = 257      # input feature channels (spectral bins)
C_PAD = 384     # Cin zero-padded to a multiple of 128 for a dense MXU K dim
HID = 128       # hidden channels
K1 = 5          # prepare conv kernel size (valid conv)
K2 = 3          # TCN conv kernel size
PAD = K2 - 1    # causal left padding (dilation = 1)


def _elu(x):
    # PyTorch nn.ELU(alpha=1.0)
    return jnp.where(x > 0, x, jnp.exp(x) - 1.0)


def _tcn_kernel(x_ref, w1_ref, b1_ref, w2a_ref, b2a_ref, w2b_ref, b2b_ref,
                o_ref, *, L1, L1_pad, apply_sigmoid):
    x = x_ref[0]                                          # (L_pad, 384) bf16
    L_pad = x.shape[0]                                    # L1_pad + 8, 8-aligned

    # Row-index iota over the (L1_pad, HID) activation tile; reused for the
    # causal-shift masks and for the pooling mask (built once, VPU compares).
    row = jax.lax.broadcasted_iota(jnp.int32, (L1_pad, HID), 0)

    # ---- prepare: Conv1d(257 -> 128, k=5, valid) + ELU ----------------------
    # shift-after-matmul: one dense bf16 matmul per tap on the un-sliced input,
    # then rotate the f32 result toward lower time indices by k rows (XLU roll,
    # overlaps with the next tap's MXU push).  Rows that wrap around the roll
    # land in [L1_pad, L_pad) and are discarded by the slice below -> no mask.
    acc = jnp.zeros((L_pad, HID), jnp.float32)
    for k in range(K1):
        y = jnp.dot(x, w1_ref[k], preferred_element_type=jnp.float32)
        if k:
            y = pltpu.roll(y, shift=L_pad - k, axis=0)    # shift up by k rows
        acc = acc + y
    h0 = _elu(acc[:L1_pad, :] + b1_ref[...])              # (L1_pad, 128) f32

    # ---- TCN residual block: causal conv -> ELU -> causal conv -> ELU -------
    def causal_conv(h_f32, w_ref, b_ref):
        h = h_f32.astype(jnp.bfloat16)
        a = jnp.zeros((L1_pad, HID), jnp.float32)
        for k in range(K2):
            y = jnp.dot(h, w_ref[k], preferred_element_type=jnp.float32)
            s = PAD - k                                   # causal left padding
            if s:
                # shift down by s rows; the first s rows are the (zero) pad.
                y = jnp.where(row < s, 0.0, pltpu.roll(y, shift=s, axis=0))
            a = a + y
        return _elu(a + b_ref[...])

    h1 = causal_conv(h0, w2a_ref, b2a_ref)
    h2 = causal_conv(h1, w2b_ref, b2b_ref)
    out = _elu(h2 + h0)                                   # residual

    # ---- pool: Flatten + AdaptiveAvgPool1d(1) == mean over (C * L1) ---------
    valid = jnp.where(row < L1, out, 0.0)                 # drop time-padding rows
    score = jnp.sum(valid) * (1.0 / float(L1 * HID))
    if apply_sigmoid:
        score = 1.0 / (1.0 + jnp.exp(-score))
    # broadcast the scalar into a lane-dense output block
    o_ref[...] = jnp.zeros((1, 1, HID), jnp.float32) + score


def tcn_forward(x, params, *, n_o=False):
    """x: (N, L, 257) float32 -> (N, 1) float32."""
    N, L, C = x.shape
    assert C == IN_C and L > K1 - 1
    L1 = L - (K1 - 1)                     # valid-conv output length
    L1_pad = -(-L1 // 8) * 8              # 8-aligned sublane extent (conv output)
    L_pad = L1_pad + 8                    # 8-aligned conv-input extent (>= L1 + 4)

    w1, b1, w2a, b2a, w2b, b2b = params
    # NOTE: weights here are (k, Cin, Cout); a real PyTorch Conv1d checkpoint
    # stores (Cout, Cin, k) and must be transposed with w.transpose(2, 1, 0).

    # Host-side layout prep: zero-pad channels 257->384 and time L->L_pad, and
    # cast the matmul operands to bf16 (f32 accumulation inside the kernel).
    xp = jnp.zeros((N, L_pad, C_PAD), jnp.bfloat16)
    xp = xp.at[:, :L, :IN_C].set(x.astype(jnp.bfloat16))
    w1p = jnp.zeros((K1, C_PAD, HID), jnp.bfloat16)
    w1p = w1p.at[:, :IN_C, :].set(w1.astype(jnp.bfloat16))
    w2a_b = w2a.astype(jnp.bfloat16)
    w2b_b = w2b.astype(jnp.bfloat16)
    b1f, b2af, b2bf = (b.astype(jnp.float32) for b in (b1, b2a, b2b))

    kernel = functools.partial(_tcn_kernel, L1=L1, L1_pad=L1_pad,
                               apply_sigmoid=n_o)

    # VMEM budget: double-buffered x block + resident weights/biases + live f32
    # activations + output block (generous safety factor, capped at 64 MiB).
    vmem_need = (2 * L_pad * C_PAD * 2
                 + (K1 * C_PAD + 2 * K2 * HID) * HID * 2
                 + 3 * HID * 4 + 2 * HID * 4
                 + 6 * L_pad * HID * 4)
    vmem_limit = int(min(64 * 1024 * 1024,
                         max(16 * 1024 * 1024, 2 * vmem_need + (4 << 20))))

    out = pl.pallas_call(
        kernel,
        out_shape=jax.ShapeDtypeStruct((N, 1, HID), jnp.float32),
        grid_spec=pltpu.PrefetchScalarGridSpec(
            num_scalar_prefetch=0,
            grid=(N,),
            in_specs=[
                pl.BlockSpec((1, L_pad, C_PAD), lambda b: (b, 0, 0)),   # x
                pl.BlockSpec((K1, C_PAD, HID), lambda b: (0, 0, 0)),    # w1 (k,Cin,Cout)
                pl.BlockSpec((1, HID), lambda b: (0, 0)),               # b1
                pl.BlockSpec((K2, HID, HID), lambda b: (0, 0, 0)),      # w2a
                pl.BlockSpec((1, HID), lambda b: (0, 0)),               # b2a
                pl.BlockSpec((K2, HID, HID), lambda b: (0, 0, 0)),      # w2b
                pl.BlockSpec((1, HID), lambda b: (0, 0)),               # b2b
            ],
            out_specs=pl.BlockSpec((1, 1, HID), lambda b: (b, 0, 0)),
        ),
        compiler_params=pltpu.CompilerParams(
            dimension_semantics=("parallel",),   # batch items independent -> v7x megacore
            vmem_limit_bytes=vmem_limit),
    )(xp, w1p, b1f, w2a_b, b2af, w2b_b, b2bf)

    # Flatten + AdaptiveAvgPool1d(1) collapses to one scalar per batch -> (N, 1)
    return out[:, 0, :1]


def tcn_reference(x, params, *, n_o=False):
    """Pure-JAX f32 reference of the same forward pass (for validation)."""
    w1, b1, w2a, b2a, w2b, b2b = params
    N, L, _ = x.shape

    def conv1d(h, w, b, left_pad):
        if left_pad:
            h = jnp.pad(h, ((0, 0), (left_pad, 0), (0, 0)))
        k = w.shape[0]
        t_out = h.shape[1] - (k - 1)
        acc = jnp.zeros((h.shape[0], t_out, w.shape[2]), jnp.float32)
        for kk in range(k):
            acc = acc + jnp.einsum('ntc,cd->ntd', h[:, kk:kk + t_out, :], w[kk])
        return acc + b.reshape(1, 1, -1)

    h0 = jax.nn.elu(conv1d(x, w1, b1, 0))
    h1 = jax.nn.elu(conv1d(h0, w2a, b2a, PAD))
    h2 = jax.nn.elu(conv1d(h1, w2b, b2b, PAD))
    out = jax.nn.elu(h2 + h0)
    score = jnp.mean(out.reshape(N, -1), axis=-1, keepdims=True)
    return jax.nn.sigmoid(score) if n_o else score


if __name__ == "__main__":
    key = jax.random.PRNGKey(0)
    kx, k1, k2, k3, k4, k5, k6 = jax.random.split(key, 7)

    N, L = 2, 16                       # small: batch=2, 16 frames, 257 bins
    x = jax.random.normal(kx, (N, L, IN_C), jnp.float32)

    def uinit(k, shape, fan_in):       # deterministic, PyTorch-like uniform init
        bound = 1.0 / (fan_in ** 0.5)
        return jax.random.uniform(k, shape, jnp.float32, -bound, bound)

    params = (
        uinit(k1, (K1, IN_C, HID), IN_C * K1),   # prepare conv weight (k, Cin, Cout)
        uinit(k2, (1, HID), IN_C * K1),          # prepare conv bias
        uinit(k3, (K2, HID, HID), HID * K2),     # TCN conv #1 weight
        uinit(k4, (1, HID), HID * K2),           # TCN conv #1 bias
        uinit(k5, (K2, HID, HID), HID * K2),     # TCN conv #2 weight
        uinit(k6, (1, HID), HID * K2),           # TCN conv #2 bias
    )

    out = jax.block_until_ready(tcn_forward(x, params, n_o=False))
    ref = tcn_reference(x, params, n_o=False)

    assert out.shape == (N, 1), out.shape
    # bf16 matmuls (f32 accumulate) vs f32 reference -> slightly looser tolerance
    assert jnp.allclose(out, ref, atol=3e-2, rtol=3e-2), (out, ref)
    print("KERNEL_OK")
</pallas_src>

<mosaic_0001>
module attributes {stable_mosaic.version = 11 : i64} {
  func.func @_tcn_kernel(%arg0: i32, %arg1: memref<1x24x384xbf16, #tpu.memory_space<vmem>>, %arg2: memref<5x384x128xbf16, #tpu.memory_space<vmem>>, %arg3: memref<1x128xf32, #tpu.memory_space<vmem>>, %arg4: memref<3x128x128xbf16, #tpu.memory_space<vmem>>, %arg5: memref<1x128xf32, #tpu.memory_space<vmem>>, %arg6: memref<3x128x128xbf16, #tpu.memory_space<vmem>>, %arg7: memref<1x128xf32, #tpu.memory_space<vmem>>, %arg8: memref<1x1x128xf32, #tpu.memory_space<vmem>>) attributes {dimension_semantics = [#tpu.dimension_semantics<parallel>], iteration_bounds = array<i64: 2>, scalar_prefetch = 0 : i64, scratch_operands = 0 : i64, tpu.core_type = #tpu.core_type<tc>, window_params = [{transform_indices = @transform_0, window_bounds = array<i64: 1, 24, 384>}, {pipeline_mode = #tpu.pipeline_mode<synchronous>, transform_indices = @transform_1, window_bounds = array<i64: 5, 384, 128>}, {pipeline_mode = #tpu.pipeline_mode<synchronous>, transform_indices = @transform_2, window_bounds = array<i64: 1, 128>}, {pipeline_mode = #tpu.pipeline_mode<synchronous>, transform_indices = @transform_3, window_bounds = array<i64: 3, 128, 128>}, {pipeline_mode = #tpu.pipeline_mode<synchronous>, transform_indices = @transform_4, window_bounds = array<i64: 1, 128>}, {pipeline_mode = #tpu.pipeline_mode<synchronous>, transform_indices = @transform_5, window_bounds = array<i64: 3, 128, 128>}, {pipeline_mode = #tpu.pipeline_mode<synchronous>, transform_indices = @transform_6, window_bounds = array<i64: 1, 128>}, {transform_indices = @transform_7, window_bounds = array<i64: 1, 1, 128>}]} {
    %c0 = arith.constant 0 : index
    %c0_0 = arith.constant 0 : index
    %c0_1 = arith.constant 0 : index
    %0 = vector.load %arg1[%c0, %c0_0, %c0_1] : memref<1x24x384xbf16, #tpu.memory_space<vmem>>, vector<1x24x384xbf16>
    %1 = vector.shape_cast %0 : vector<1x24x384xbf16> to vector<24x384xbf16>
    %2 = tpu.iota {dimensions = array<i32: 0>} : vector<16x128xi32>
    %cst = arith.constant 0.000000e+00 : f32
    %3 = vector.broadcast %cst : f32 to vector<24x128xf32>
    %c0_2 = arith.constant 0 : index
    %c0_3 = arith.constant 0 : index
    %c0_4 = arith.constant 0 : index
    %4 = vector.load %arg2[%c0_2, %c0_3, %c0_4] : memref<5x384x128xbf16, #tpu.memory_space<vmem>>, vector<1x384x128xbf16>
    %5 = vector.shape_cast %4 : vector<1x384x128xbf16> to vector<384x128xbf16>
    %cst_5 = arith.constant dense<0.000000e+00> : vector<24x128xf32>
    %6 = tpu.matmul %1, %5, %cst_5 {dimension_numbers = #tpu.dot_dimension_numbers<[1], [0], [0], [1], [0, 0, 1, 1], [], []>} : vector<24x384xbf16>, vector<384x128xbf16>, vector<24x128xf32> -> vector<24x128xf32>
    %7 = arith.addf %3, %6 : vector<24x128xf32>
    %c1 = arith.constant 1 : index
    %c0_6 = arith.constant 0 : index
    %c0_7 = arith.constant 0 : index
    %8 = vector.load %arg2[%c1, %c0_6, %c0_7] : memref<5x384x128xbf16, #tpu.memory_space<vmem>>, vector<1x384x128xbf16>
    %9 = vector.shape_cast %8 : vector<1x384x128xbf16> to vector<384x128xbf16>
    %cst_8 = arith.constant dense<0.000000e+00> : vector<24x128xf32>
    %10 = tpu.matmul %1, %9, %cst_8 {dimension_numbers = #tpu.dot_dimension_numbers<[1], [0], [0], [1], [0, 0, 1, 1], [], []>} : vector<24x384xbf16>, vector<384x128xbf16>, vector<24x128xf32> -> vector<24x128xf32>
    %c23_i32 = arith.constant 23 : i32
    %11 = tpu.dynamic_rotate %10 by %c23_i32 dim 0 : vector<24x128xf32>, i32 -> vector<24x128xf32>
    %12 = arith.addf %7, %11 : vector<24x128xf32>
    %c2 = arith.constant 2 : index
    %c0_9 = arith.constant 0 : index
    %c0_10 = arith.constant 0 : index
    %13 = vector.load %arg2[%c2, %c0_9, %c0_10] : memref<5x384x128xbf16, #tpu.memory_space<vmem>>, vector<1x384x128xbf16>
    %14 = vector.shape_cast %13 : vector<1x384x128xbf16> to vector<384x128xbf16>
    %cst_11 = arith.constant dense<0.000000e+00> : vector<24x128xf32>
    %15 = tpu.matmul %1, %14, %cst_11 {dimension_numbers = #tpu.dot_dimension_numbers<[1], [0], [0], [1], [0, 0, 1, 1], [], []>} : vector<24x384xbf16>, vector<384x128xbf16>, vector<24x128xf32> -> vector<24x128xf32>
    %c22_i32 = arith.constant 22 : i32
    %16 = tpu.dynamic_rotate %15 by %c22_i32 dim 0 : vector<24x128xf32>, i32 -> vector<24x128xf32>
    %17 = arith.addf %12, %16 : vector<24x128xf32>
    %c3 = arith.constant 3 : index
    %c0_12 = arith.constant 0 : index
    %c0_13 = arith.constant 0 : index
    %18 = vector.load %arg2[%c3, %c0_12, %c0_13] : memref<5x384x128xbf16, #tpu.memory_space<vmem>>, vector<1x384x128xbf16>
    %19 = vector.shape_cast %18 : vector<1x384x128xbf16> to vector<384x128xbf16>
    %cst_14 = arith.constant dense<0.000000e+00> : vector<24x128xf32>
    %20 = tpu.matmul %1, %19, %cst_14 {dimension_numbers = #tpu.dot_dimension_numbers<[1], [0], [0], [1], [0, 0, 1, 1], [], []>} : vector<24x384xbf16>, vector<384x128xbf16>, vector<24x128xf32> -> vector<24x128xf32>
    %c21_i32 = arith.constant 21 : i32
    %21 = tpu.dynamic_rotate %20 by %c21_i32 dim 0 : vector<24x128xf32>, i32 -> vector<24x128xf32>
    %22 = arith.addf %17, %21 : vector<24x128xf32>
    %c4 = arith.constant 4 : index
    %c0_15 = arith.constant 0 : index
    %c0_16 = arith.constant 0 : index
    %23 = vector.load %arg2[%c4, %c0_15, %c0_16] : memref<5x384x128xbf16, #tpu.memory_space<vmem>>, vector<1x384x128xbf16>
    %24 = vector.shape_cast %23 : vector<1x384x128xbf16> to vector<384x128xbf16>
    %cst_17 = arith.constant dense<0.000000e+00> : vector<24x128xf32>
    %25 = tpu.matmul %1, %24, %cst_17 {dimension_numbers = #tpu.dot_dimension_numbers<[1], [0], [0], [1], [0, 0, 1, 1], [], []>} : vector<24x384xbf16>, vector<384x128xbf16>, vector<24x128xf32> -> vector<24x128xf32>
    %c20_i32 = arith.constant 20 : i32
    %26 = tpu.dynamic_rotate %25 by %c20_i32 dim 0 : vector<24x128xf32>, i32 -> vector<24x128xf32>
    %27 = arith.addf %22, %26 : vector<24x128xf32>
    %28 = vector.extract_strided_slice %27 {offsets = [0, 0], sizes = [16, 128], strides = [1, 1]} : vector<24x128xf32> to vector<16x128xf32>
    %c0_18 = arith.constant 0 : index
    %c0_19 = arith.constant 0 : index
    %29 = vector.load %arg3[%c0_18, %c0_19] : memref<1x128xf32, #tpu.memory_space<vmem>>, vector<1x128xf32>
    %30 = vector.broadcast %29 : vector<1x128xf32> to vector<16x128xf32>
    %31 = arith.addf %28, %30 : vector<16x128xf32>
    %cst_20 = arith.constant 0.000000e+00 : f32
    %32 = vector.broadcast %cst_20 : f32 to vector<16x128xf32>
    %33 = arith.cmpf ogt, %31, %32 : vector<16x128xf32>
    %34 = math.exp %31 : vector<16x128xf32>
    %cst_21 = arith.constant 1.000000e+00 : f32
    %35 = vector.broadcast %cst_21 : f32 to vector<16x128xf32>
    %36 = arith.subf %34, %35 : vector<16x128xf32>
    %37 = arith.select %33, %31, %36 : vector<16x128xi1>, vector<16x128xf32>
    %38 = arith.truncf %37 : vector<16x128xf32> to vector<16x128xbf16>
    %cst_22 = arith.constant 0.000000e+00 : f32
    %39 = vector.broadcast %cst_22 : f32 to vector<16x128xf32>
    %c0_23 = arith.constant 0 : index
    %c0_24 = arith.constant 0 : index
    %c0_25 = arith.constant 0 : index
    %40 = vector.load %arg4[%c0_23, %c0_24, %c0_25] : memref<3x128x128xbf16, #tpu.memory_space<vmem>>, vector<1x128x128xbf16>
    %41 = vector.shape_cast %40 : vector<1x128x128xbf16> to vector<128x128xbf16>
    %cst_26 = arith.constant dense<0.000000e+00> : vector<16x128xf32>
    %42 = tpu.matmul %38, %41, %cst_26 {dimension_numbers = #tpu.dot_dimension_numbers<[1], [0], [0], [1], [0, 0, 1, 1], [], []>} : vector<16x128xbf16>, vector<128x128xbf16>, vector<16x128xf32> -> vector<16x128xf32>
    %c2_i32 = arith.constant 2 : i32
    %43 = vector.broadcast %c2_i32 : i32 to vector<16x128xi32>
    %44 = arith.cmpi slt, %2, %43 : vector<16x128xi32>
    %c2_i32_27 = arith.constant 2 : i32
    %45 = tpu.dynamic_rotate %42 by %c2_i32_27 dim 0 : vector<16x128xf32>, i32 -> vector<16x128xf32>
    %cst_28 = arith.constant 0.000000e+00 : f32
    %46 = vector.broadcast %cst_28 : f32 to vector<16x128xf32>
    %47 = arith.select %44, %46, %45 : vector<16x128xi1>, vector<16x128xf32>
    %48 = arith.addf %39, %47 : vector<16x128xf32>
    %c1_29 = arith.constant 1 : index
    %c0_30 = arith.constant 0 : index
    %c0_31 = arith.constant 0 : index
    %49 = vector.load %arg4[%c1_29, %c0_30, %c0_31] : memref<3x128x128xbf16, #tpu.memory_space<vmem>>, vector<1x128x128xbf16>
    %50 = vector.shape_cast %49 : vector<1x128x128xbf16> to vector<128x128xbf16>
    %cst_32 = arith.constant dense<0.000000e+00> : vector<16x128xf32>
    %51 = tpu.matmul %38, %50, %cst_32 {dimension_numbers = #tpu.dot_dimension_numbers<[1], [0], [0], [1], [0, 0, 1, 1], [], []>} : vector<16x128xbf16>, vector<128x128xbf16>, vector<16x128xf32> -> vector<16x128xf32>
    %c1_i32 = arith.constant 1 : i32
    %52 = vector.broadcast %c1_i32 : i32 to vector<16x128xi32>
    %53 = arith.cmpi slt, %2, %52 : vector<16x128xi32>
    %c1_i32_33 = arith.constant 1 : i32
    %54 = tpu.dynamic_rotate %51 by %c1_i32_33 dim 0 : vector<16x128xf32>, i32 -> vector<16x128xf32>
    %cst_34 = arith.constant 0.000000e+00 : f32
    %55 = vector.broadcast %cst_34 : f32 to vector<16x128xf32>
    %56 = arith.select %53, %55, %54 : vector<16x128xi1>, vector<16x128xf32>
    %57 = arith.addf %48, %56 : vector<16x128xf32>
    %c2_35 = arith.constant 2 : index
    %c0_36 = arith.constant 0 : index
    %c0_37 = arith.constant 0 : index
    %58 = vector.load %arg4[%c2_35, %c0_36, %c0_37] : memref<3x128x128xbf16, #tpu.memory_space<vmem>>, vector<1x128x128xbf16>
    %59 = vector.shape_cast %58 : vector<1x128x128xbf16> to vector<128x128xbf16>
    %cst_38 = arith.constant dense<0.000000e+00> : vector<16x128xf32>
    %60 = tpu.matmul %38, %59, %cst_38 {dimension_numbers = #tpu.dot_dimension_numbers<[1], [0], [0], [1], [0, 0, 1, 1], [], []>} : vector<16x128xbf16>, vector<128x128xbf16>, vector<16x128xf32> -> vector<16x128xf32>
    %61 = arith.addf %57, %60 : vector<16x128xf32>
    %c0_39 = arith.constant 0 : index
    %c0_40 = arith.constant 0 : index
    %62 = vector.load %arg5[%c0_39, %c0_40] : memref<1x128xf32, #tpu.memory_space<vmem>>, vector<1x128xf32>
    %63 = vector.broadcast %62 : vector<1x128xf32> to vector<16x128xf32>
    %64 = arith.addf %61, %63 : vector<16x128xf32>
    %cst_41 = arith.constant 0.000000e+00 : f32
    %65 = vector.broadcast %cst_41 : f32 to vector<16x128xf32>
    %66 = arith.cmpf ogt, %64, %65 : vector<16x128xf32>
    %67 = math.exp %64 : vector<16x128xf32>
    %cst_42 = arith.constant 1.000000e+00 : f32
    %68 = vector.broadcast %cst_42 : f32 to vector<16x128xf32>
    %69 = arith.subf %67, %68 : vector<16x128xf32>
    %70 = arith.select %66, %64, %69 : vector<16x128xi1>, vector<16x128xf32>
    %71 = arith.truncf %70 : vector<16x128xf32> to vector<16x128xbf16>
    %cst_43 = arith.constant 0.000000e+00 : f32
    %72 = vector.broadcast %cst_43 : f32 to vector<16x128xf32>
    %c0_44 = arith.constant 0 : index
    %c0_45 = arith.constant 0 : index
    %c0_46 = arith.constant 0 : index
    %73 = vector.load %arg6[%c0_44, %c0_45, %c0_46] : memref<3x128x128xbf16, #tpu.memory_space<vmem>>, vector<1x128x128xbf16>
    %74 = vector.shape_cast %73 : vector<1x128x128xbf16> to vector<128x128xbf16>
    %cst_47 = arith.constant dense<0.000000e+00> : vector<16x128xf32>
    %75 = tpu.matmul %71, %74, %cst_47 {dimension_numbers = #tpu.dot_dimension_numbers<[1], [0], [0], [1], [0, 0, 1, 1], [], []>} : vector<16x128xbf16>, vector<128x128xbf16>, vector<16x128xf32> -> vector<16x128xf32>
    %c2_i32_48 = arith.constant 2 : i32
    %76 = vector.broadcast %c2_i32_48 : i32 to vector<16x128xi32>
    %77 = arith.cmpi slt, %2, %76 : vector<16x128xi32>
    %c2_i32_49 = arith.constant 2 : i32
    %78 = tpu.dynamic_rotate %75 by %c2_i32_49 dim 0 : vector<16x128xf32>, i32 -> vector<16x128xf32>
    %cst_50 = arith.constant 0.000000e+00 : f32
    %79 = vector.broadcast %cst_50 : f32 to vector<16x128xf32>
    %80 = arith.select %77, %79, %78 : vector<16x128xi1>, vector<16x128xf32>
    %81 = arith.addf %72, %80 : vector<16x128xf32>
    %c1_51 = arith.constant 1 : index
    %c0_52 = arith.constant 0 : index
    %c0_53 = arith.constant 0 : index
    %82 = vector.load %arg6[%c1_51, %c0_52, %c0_53] : memref<3x128x128xbf16, #tpu.memory_space<vmem>>, vector<1x128x128xbf16>
    %83 = vector.shape_cast %82 : vector<1x128x128xbf16> to vector<128x128xbf16>
    %cst_54 = arith.constant dense<0.000000e+00> : vector<16x128xf32>
    %84 = tpu.matmul %71, %83, %cst_54 {dimension_numbers = #tpu.dot_dimension_numbers<[1], [0], [0], [1], [0, 0, 1, 1], [], []>} : vector<16x128xbf16>, vector<128x128xbf16>, vector<16x128xf32> -> vector<16x128xf32>
    %c1_i32_55 = arith.constant 1 : i32
    %85 = vector.broadcast %c1_i32_55 : i32 to vector<16x128xi32>
    %86 = arith.cmpi slt, %2, %85 : vector<16x128xi32>
    %c1_i32_56 = arith.constant 1 : i32
    %87 = tpu.dynamic_rotate %84 by %c1_i32_56 dim 0 : vector<16x128xf32>, i32 -> vector<16x128xf32>
    %cst_57 = arith.constant 0.000000e+00 : f32
    %88 = vector.broadcast %cst_57 : f32 to vector<16x128xf32>
    %89 = arith.select %86, %88, %87 : vector<16x128xi1>, vector<16x128xf32>
    %90 = arith.addf %81, %89 : vector<16x128xf32>
    %c2_58 = arith.constant 2 : index
    %c0_59 = arith.constant 0 : index
    %c0_60 = arith.constant 0 : index
    %91 = vector.load %arg6[%c2_58, %c0_59, %c0_60] : memref<3x128x128xbf16, #tpu.memory_space<vmem>>, vector<1x128x128xbf16>
    %92 = vector.shape_cast %91 : vector<1x128x128xbf16> to vector<128x128xbf16>
    %cst_61 = arith.constant dense<0.000000e+00> : vector<16x128xf32>
    %93 = tpu.matmul %71, %92, %cst_61 {dimension_numbers = #tpu.dot_dimension_numbers<[1], [0], [0], [1], [0, 0, 1, 1], [], []>} : vector<16x128xbf16>, vector<128x128xbf16>, vector<16x128xf32> -> vector<16x128xf32>
    %94 = arith.addf %90, %93 : vector<16x128xf32>
    %c0_62 = arith.constant 0 : index
    %c0_63 = arith.constant 0 : index
    %95 = vector.load %arg7[%c0_62, %c0_63] : memref<1x128xf32, #tpu.memory_space<vmem>>, vector<1x128xf32>
    %96 = vector.broadcast %95 : vector<1x128xf32> to vector<16x128xf32>
    %97 = arith.addf %94, %96 : vector<16x128xf32>
    %cst_64 = arith.constant 0.000000e+00 : f32
    %98 = vector.broadcast %cst_64 : f32 to vector<16x128xf32>
    %99 = arith.cmpf ogt, %97, %98 : vector<16x128xf32>
    %100 = math.exp %97 : vector<16x128xf32>
    %cst_65 = arith.constant 1.000000e+00 : f32
    %101 = vector.broadcast %cst_65 : f32 to vector<16x128xf32>
    %102 = arith.subf %100, %101 : vector<16x128xf32>
    %103 = arith.select %99, %97, %102 : vector<16x128xi1>, vector<16x128xf32>
    %104 = arith.addf %103, %37 : vector<16x128xf32>
    %cst_66 = arith.constant 0.000000e+00 : f32
    %105 = vector.broadcast %cst_66 : f32 to vector<16x128xf32>
    %106 = arith.cmpf ogt, %104, %105 : vector<16x128xf32>
    %107 = math.exp %104 : vector<16x128xf32>
    %cst_67 = arith.constant 1.000000e+00 : f32
    %108 = vector.broadcast %cst_67 : f32 to vector<16x128xf32>
    %109 = arith.subf %107, %108 : vector<16x128xf32>
    %110 = arith.select %106, %104, %109 : vector<16x128xi1>, vector<16x128xf32>
    %c12_i32 = arith.constant 12 : i32
    %111 = vector.broadcast %c12_i32 : i32 to vector<16x128xi32>
    %112 = arith.cmpi slt, %2, %111 : vector<16x128xi32>
    %cst_68 = arith.constant 0.000000e+00 : f32
    %113 = vector.broadcast %cst_68 : f32 to vector<16x128xf32>
    %114 = arith.select %112, %110, %113 : vector<16x128xi1>, vector<16x128xf32>
    %115 = vector.shape_cast %114 : vector<16x128xf32> to vector<1x16x128xf32>
    %cst_69 = arith.constant dense<0.000000e+00> : vector<1xf32>
    %116 = vector.multi_reduction <add>, %115, %cst_69 [1, 2] : vector<1x16x128xf32> to vector<1xf32>
    %117 = vector.shape_cast %116 : vector<1xf32> to vector<1x1x1xf32>
    %118 = vector.extract %117[0, 0, 0] : f32 from vector<1x1x1xf32>
    %cst_70 = arith.constant 6.51041686E-4 : f32
    %119 = arith.mulf %118, %cst_70 : f32
    %cst_71 = arith.constant 0.000000e+00 : f32
    %120 = vector.broadcast %cst_71 : f32 to vector<1x1x128xf32>
    %121 = vector.broadcast %119 : f32 to vector<1x1x128xf32>
    %122 = arith.addf %120, %121 : vector<1x1x128xf32>
    %c0_72 = arith.constant 0 : index
    %c0_73 = arith.constant 0 : index
    %c0_74 = arith.constant 0 : index
    %123 = vector.load %arg8[%c0_72, %c0_73, %c0_74] : memref<1x1x128xf32, #tpu.memory_space<vmem>>, vector<1x1x128xf32>
    tpu.vector_store %arg8[%c0_72, %c0_73, %c0_74], %122 {strides = array<i32>} : memref<1x1x128xf32, #tpu.memory_space<vmem>>, vector<1x1x128xf32>,
    return
  }
  func.func @transform_0(%arg0: i32) -> (i32, i32, i32) {
    %c0_i32 = arith.constant 0 : i32
    %c0_i32_0 = arith.constant 0 : i32
    %c0_i32_1 = arith.constant 0 : i32
    return %arg0, %c0_i32, %c0_i32_0 : i32, i32, i32
  }
  func.func @transform_1(%arg0: i32) -> (i32, i32, i32) {
    %c0_i32 = arith.constant 0 : i32
    %c0_i32_0 = arith.constant 0 : i32
    %c0_i32_1 = arith.constant 0 : i32
    %c0_i32_2 = arith.constant 0 : i32
    return %c0_i32, %c0_i32_0, %c0_i32_1 : i32, i32, i32
  }
  func.func @transform_2(%arg0: i32) -> (i32, i32) {
    %c0_i32 = arith.constant 0 : i32
    %c0_i32_0 = arith.constant 0 : i32
    %c0_i32_1 = arith.constant 0 : i32
    return %c0_i32, %c0_i32_0 : i32, i32
  }
  func.func @transform_3(%arg0: i32) -> (i32, i32, i32) {
    %c0_i32 = arith.constant 0 : i32
    %c0_i32_0 = arith.constant 0 : i32
    %c0_i32_1 = arith.constant 0 : i32
    %c0_i32_2 = arith.constant 0 : i32
    return %c0_i32, %c0_i32_0, %c0_i32_1 : i32, i32, i32
  }
  func.func @transform_4(%arg0: i32) -> (i32, i32) {
    %c0_i32 = arith.constant 0 : i32
    %c0_i32_0 = arith.constant 0 : i32
    %c0_i32_1 = arith.constant 0 : i32
    return %c0_i32, %c0_i32_0 : i32, i32
  }
  func.func @transform_5(%arg0: i32) -> (i32, i32, i32) {
    %c0_i32 = arith.constant 0 : i32
    %c0_i32_0 = arith.constant 0 : i32
    %c0_i32_1 = arith.constant 0 : i32
    %c0_i32_2 = arith.constant 0 : i32
    return %c0_i32, %c0_i32_0, %c0_i32_1 : i32, i32, i32
  }
  func.func @transform_6(%arg0: i32) -> (i32, i32) {
    %c0_i32 = arith.constant 0 : i32
    %c0_i32_0 = arith.constant 0 : i32
    %c0_i32_1 = arith.constant 0 : i32
    return %c0_i32, %c0_i32_0 : i32, i32
  }
  func.func @transform_7(%arg0: i32) -> (i32, i32, i32) {
    %c0_i32 = arith.constant 0 : i32
    %c0_i32_0 = arith.constant 0 : i32
    %c0_i32_1 = arith.constant 0 : i32
    return %arg0, %c0_i32, %c0_i32_0 : i32, i32, i32
  }
}

</mosaic_0001>

<bundles_post_ra>
// kernel: tpu_custom_call.1
= control target key start
LH: loop header
LB: loop body
LE: loop exit
PB: predicated region body
PF: predicated region fallthrough
CT: control target
= control target key end

     0   :  { %12 = vsyncpa [#allocation3], 0  ;;  %s4335_s0 = inlined_call_operand.hbm [shape: bf16[2,24,384], index: 0, kind: input, shape index: {}]   ;;  %s4336_s1 = inlined_call_operand.hbm [shape: bf16[5,384,128], index: 1, kind: input, shape index: {}]   ;;  %s4337_s2 = inlined_call_operand.vmem [shape: f32[1,128], index: 2, kind: input, shape index: {}]   ;;  %s4338_s3 = inlined_call_operand.hbm [shape: bf16[3,128,128], index: 3, kind: input, shape index: {}]   ;;  %s4339_s4 = inlined_call_operand.vmem [shape: f32[1,128], index: 4, kind: input, shape index: {}]   ;;  %s4340_s5 = inlined_call_operand.hbm [shape: bf16[3,128,128], index: 5, kind: input, shape index: {}]   ;;  %s4341_s6 = inlined_call_operand.vmem [shape: f32[1,128], index: 6, kind: input, shape index: {}]   ;;  %s4342_s7 = inlined_call_operand.hbm [shape: f32[2,1,128], index: 7, kind: output, shape index: {}]  }
   0x1   :  { %14 = vsyncpa [#allocation3 + $0x1], 0 }
   0x2   :  { %15 = vsyncpa [#allocation6], 0 }
   0x3   :  { %16 = vsyncpa [#allocation9], 0 }
   0x4   :  { %17 = vsyncpa [#allocation4], 0 }
   0x5   :  { %19 = vsyncpa [#allocation4 + $0x1], 0  ;;  %s3905_s24 = smov 0   ;;  %s3907_s25 = smov 0  }
   0x6   :  { %s3909_s26 = smov 0   ;;  %s3911_s27 = smov 0  }
   0x7 LB: > { %s3926_s28 = sadd.s32 4294967295, %s3852_s27   ;;  %s2720_s29 = sadd.s32 4294967294, %s3852_s27   ;;  %s3852_s27 = sphi %s3911_s27, %s4368_s27   ;;  %s3848_s26 = sphi %s3909_s26, %s4367_s26   ;;  %s3844_s25 = sphi %s3907_s25, %s4366_s25   ;;  %s3840_s24 = sphi %s3905_s24, %s4365_s24  }
   0x8   : > { %p45_p0 = scmp.ne.s32.totalorder %s3844_s25, %s3840_s24  ;;  %p4343_p1 = scmp.eq.s32.totalorder %s3926_s28, 0 }
   0x9   : > { %p201_p3 = scmp.eq.s32.totalorder %s2720_s29, 1  ;;  %p2721_p5 = scmp.ge.s32.totalorder %s3852_s27, 1 }
   0xa   : > { %p3935_p4 = por %p4343_p1, %p45_p0  ;;  %p208_p7 = scmp.lt.s32.totalorder %s3852_s27, 3 }
   0xb   : > { %p3940_p6 = por %p201_p3, %p45_p0  ;;  %s3854_s10 = smov [#allocation5]  }
   0xc   : > { %s4347_s30 = scalar_select %p3935_p4, 1, 0 }
   0xd   : > { %s4348_s8 = scalar_select %p3940_p6, 1, 0 }
   0xe   : > { %p3945_p8 = pnand %p2721_p5, %p208_p7  ;;  %s220_s11 = sshll.u32 %s3854_s10, 4  ;;  %s3949_s11 = int_to_ptr.vmem [resolvable:$true] %s220_s11 }
   0xf   : > { %4349 = sst [smem:[#allocation15_spill]] %s4348_s8  ;;  %s3855_s13 = smov [#allocation7]  }
  0x10   : > { %s4350_s9 = scalar_select %p3945_p8, 1, 0 }
  0x11   : > { %p3404_p9 = pneg %p3945_p8  ;;  %s236_s14 = sshll.u32 %s3855_s13, 4  ;;  %s3960_s14 = int_to_ptr.vmem [resolvable:$true] %s236_s14 }
  0x12   : > { %s3856_s15 = smov [#allocation8]   ;;  %s3664_s19 = scalar_lea.hbm %s4336_s1, 15360 }
  0x13   : > { %p3956_p11 = pnand %p3404_p9, %p4343_p1  ;;  %s3962_s16 = sshll.u32 %s3856_s15, 4  ;;  %s253_s16 = int_to_ptr.vmem [resolvable:$true] %s3962_s16 }
  0x14   : > { %p3665_p12 = scmp.ne.s32.totalorder %s4336_s1, %s3664_s19  ;;  %p3671_p5 = scmp.lt.u32.totalorder %s3664_s19, %s4336_s1 }
  0x15   : > { %p3972_p13 = pneg %p3956_p11 }
  0x17   : > { %p3667_p0 = pnand %p3972_p13, %p3665_p12 }
  0x19   : > { %p3668_p3 = pneg %p3667_p0 }
  0x1b   : > { %p3673_p7 = pnand %p3671_p5, %p3668_p3 }
  0x1d   : > { %3676 = shalt.err (!%p3673_p7)
}
  0x1e   : > { %s3677_s10 = scalar_lea.vmem %s3949_s11, 15360  ;;  %p3685_p2 = scmp.lt.s32.totalorder %s3949_s11, %s3949_s11 }
  0x1f   : > { %p3678_p9 = scmp.ne.s32.totalorder %s3949_s11, %s3677_s10  ;;  %p3686_p6 = scmp.lt.s32.totalorder %s3677_s10, %s3677_s10 }
  0x21   : > { %p3680_p10 = pnand %p3678_p9, %p3972_p13  ;;  %p3687_p12 = por %p3686_p6, %p3685_p2 }
  0x23   : > { %p3681_p1 = pneg %p3680_p10 }
  0x25   : > { %p3688_p0 = pnand %p3687_p12, %p3681_p1 }
  0x27   : > { %3691 = shalt.err (!%p3688_p0)
}
  0x28   : > { %s3857_s13 = smov 64   ;;  %s3858_s15 = smov 4  }
  0x29   : > { %3407 = dma.hbm_to_vmem [thread:$0]  (!%p3956_p11), %s4336_s1, 15360, %s3949_s11, [#allocation6], %s3857_s13, %s3857_s13, %s3858_s15  }
  0x2a   : > { %s3692_s21 = scalar_lea.hbm %s4338_s3, 3072 }
  0x2b   : > { %p3693_p1 = scmp.ne.s32.totalorder %s4338_s3, %s3692_s21  ;;  %p3699_p10 = scmp.lt.u32.totalorder %s3692_s21, %s4338_s3 }
  0x2d   : > { %p3695_p2 = pnand %p3693_p1, %p3972_p13 }
  0x2f   : > { %p3696_p6 = pneg %p3695_p2 }
  0x31   : > { %p3701_p3 = pnand %p3699_p10, %p3696_p6 }
  0x33   : > { %3704 = shalt.err (!%p3701_p3)
}
  0x34   : > { %s3705_s11 = scalar_lea.vmem %s3960_s14, 3072  ;;  %p3713_p12 = scmp.lt.s32.totalorder %s3960_s14, %s3960_s14 }
  0x35   : > { %p3706_p5 = scmp.ne.s32.totalorder %s3960_s14, %s3705_s11  ;;  %p3714_p0 = scmp.lt.s32.totalorder %s3705_s11, %s3705_s11 }
  0x37   : > { %p3708_p7 = pnand %p3706_p5, %p3972_p13  ;;  %p3715_p1 = por %p3714_p0, %p3713_p12 }
  0x39   : > { %p3709_p9 = pneg %p3708_p7 }
  0x3b   : > { %p3716_p2 = pnand %p3715_p1, %p3709_p9 }
  0x3d   : > { %3719 = shalt.err (!%p3716_p2)
}
  0x3e   : > { %3410 = dma.hbm_to_vmem [thread:$0]  (!%p3956_p11), %s4338_s3, 3072, %s3960_s14, [#allocation6], %s3857_s13, %s3857_s13, %s3858_s15  }
  0x3f   : > { %s3720_s20 = scalar_lea.hbm %s4340_s5, 3072 }
  0x40   : > { %p3721_p6 = scmp.ne.s32.totalorder %s4340_s5, %s3720_s20  ;;  %p3727_p5 = scmp.lt.u32.totalorder %s3720_s20, %s4340_s5 }
  0x42   : > { %p3723_p10 = pnand %p3721_p6, %p3972_p13 }
  0x44   : > { %p3724_p3 = pneg %p3723_p10 }
  0x46   : > { %p3729_p7 = pnand %p3727_p5, %p3724_p3 }
  0x48   : > { %3732 = shalt.err (!%p3729_p7)
}
  0x49   : > { %s3733_s11 = scalar_lea.vmem %s253_s16, 3072  ;;  %p3741_p1 = scmp.lt.s32.totalorder %s253_s16, %s253_s16 }
  0x4a   : > { %p3734_p9 = scmp.ne.s32.totalorder %s253_s16, %s3733_s11  ;;  %p3742_p2 = scmp.lt.s32.totalorder %s3733_s11, %s3733_s11 }
  0x4c   : > { %p3736_p12 = pnand %p3734_p9, %p3972_p13  ;;  %p3743_p4 = por %p3742_p2, %p3741_p1 }
  0x4e   : > { %p3737_p0 = pneg %p3736_p12 }
  0x50   : > { %p3744_p8 = pnand %p3743_p4, %p3737_p0 }
  0x52   : > { %3747 = shalt.err (!%p3744_p8)
}
  0x53   : > { %3413 = dma.hbm_to_vmem [thread:$0]  (!%p3956_p11), %s4340_s5, 3072, %s253_s16, [#allocation9], %s3857_s13, %s3857_s13, %s3858_s15  }
  0x54   : > { %s4045_s22 = sadd.s32 1, %s3852_s27   ;;  %s32_s17 = sadd.s32 1, %s3848_s26 }
  0x55   : > { %s29_s12 = ssub.s32 %s3852_s27, %s4045_s22  ;;  %p39_p8 = scmp.ne.s32.totalorder %s3848_s26, %s3844_s25 }
  0x56   : > { %p30_p4 = scmp.eq.s32.totalorder %s29_s12, 0  ;;  %p40_p13 = scmp.eq.s32.totalorder %s3852_s27, 0 }
  0x57   : > { %p3425_p6 = scmp.lt.s32.totalorder %s3852_s27, 2  ;;  %p4353_p3 = scmp.eq.s32.totalorder %s3926_s28, 1 }
  0x58   : > { %s4055_s18 = scalar_select %p30_p4, %s3848_s26, %s32_s17  }
  0x59   : > { %p41_p10 = por %p40_p13, %p39_p8  ;;  %p4059_p5 = por %p4353_p3, %p39_p8 }
  0x5a   : > { %s269_s20 = sand.u32 1, %s3848_s26   ;;  %s3384_s21 = smul.u32 576, %s3852_s27 }
  0x5b   : > { %s3383_s16 = smul.u32 36, %s269_s20  ;;  %p4070_p11 = pnand %p3425_p6, %p41_p10 }
  0x5c   : > { %s4068_s23 = scalar_lea.hbm %s4335_s0, %s3384_s21  ;;  %s4076_s14 = scalar_lea.sflag [#allocation3], %s269_s20 }
  0x5d   : > { %s273_s10 = scalar_lea.vmem [#allocation2], %s3383_s16  ;;  %s3748_s8 = scalar_lea.hbm %s4068_s23, 576 }
  0x5e   : > { %s280_s11 = sshll.u32 %s273_s10, 4  ;;  %p3749_p7 = scmp.ne.s32.totalorder %s4068_s23, %s3748_s8  ;;  %s4074_s11 = int_to_ptr.vmem [resolvable:$true] %s280_s11 }
  0x5f   : > { %p3750_p9 = pneg %p4070_p11  ;;  %s3753_s21 = scalar_lea.hbm %s4335_s0, 1152 }
  0x60   : > { %p3754_p1 = scmp.lt.u32.totalorder %s4068_s23, %s4335_s0  ;;  %p3755_p2 = scmp.lt.u32.totalorder %s3753_s21, %s3748_s8 }
  0x61   : > { %p3751_p12 = pnand %p3750_p9, %p3749_p7  ;;  %p3757_p8 = scmp.lt.u32.totalorder %s3748_s8, %s4068_s23 }
  0x62   : > { %p3756_p4 = por %p3755_p2, %p3754_p1 }
  0x63   : > { %p3752_p0 = pneg %p3751_p12 }
  0x64   : > { %p3758_p13 = por %p3757_p8, %p3756_p4 }
  0x66   : > { %p3759_p6 = pnand %p3758_p13, %p3752_p0 }
  0x68   : > { %3762 = shalt.err (!%p3759_p6)
}
  0x69   : > { %s3763_s20 = scalar_lea.vmem %s4074_s11, 576  ;;  %s3859_s16 = smov [#allocation2]  }
  0x6a   : > { %p3764_p10 = scmp.ne.s32.totalorder %s4074_s11, %s3763_s20  ;;  %s3768_s10 = sshll.u32 %s3859_s16, 4  ;;  %s3769_s10 = int_to_ptr.vmem [resolvable:$false] %s3768_s10 }
  0x6b   : > { %s3770_s12 = scalar_lea.vmem %s3769_s10, 1152  ;;  %p3771_p12 = scmp.lt.s32.totalorder %s4074_s11, %s3769_s10 }
  0x6c   : > { %p3766_p3 = pnand %p3764_p10, %p3750_p9  ;;  %p3772_p1 = scmp.lt.s32.totalorder %s3770_s12, %s3763_s20 }
  0x6e   : > { %p3767_p7 = pneg %p3766_p3  ;;  %p3773_p2 = por %p3772_p1, %p3771_p12 }
  0x70   : > { %p3774_p4 = pnand %p3773_p2, %p3767_p7 }
  0x72   : > { %3777 = shalt.err (!%p3774_p4)
}
  0x73   : > { %s3860_s8 = smov 192   ;;  %s3861_s17 = smov 12  }
  0x74   : > { %3417 = dma.hbm_to_vmem [thread:$0]  (!%p4070_p11), %s4068_s23, 576, %s4074_s11, %s4076_s14, %s3860_s8, %s3860_s8, %s3861_s17  }
  0x75   : > { %p4356_p9 = scmp.ne.s32.totalorder %s4350_s9, 0 }
  0x76   : > { %s4107_s21 = sand.u32 (!%p4356_p9), 1, %s3844_s25   ;;  %p4357_p0 = scmp.ne.s32.totalorder (!%p4356_p9), %s4347_s30, 0 }
  0x77   : > { %292 = sbr.rel (%p4356_p9) target bundleno = 1321 (0x529), region = 48  ;;  %s295_s15 = scalar_lea.sflag (!%p4356_p9), [#allocation3], %s4107_s21 }
  0x78   : > { %s3385_s13 = smul.u32 (!%p4356_p9), 36, %s4107_s21 }
  0x7a   : > { %s4111_s20 = scalar_lea.vmem (!%p4356_p9), [#allocation2], %s3385_s13 }
  0x7e   : > { %3823 = dma.done.wait (%p4357_p0), %s295_s15, 576  }
  0x7f   : > { %3825 = vsyncadd (%p4357_p0), %s295_s15, 4294966720  ;;  %p4358_p11 = scmp.eq.s32.totalorder %s3926_s28, 0 }
  0x81   : > { %3827 = dma.done.wait (%p4358_p11), [#allocation6], 18432   ;;  %p4359_p8 = pmov %p4358_p11 }
  0x83   : > { %3829 = vsyncadd (%p4359_p8), [#allocation6], 4294948864  ;;  %p4360_p13 = pmov %p4359_p8 }
  0x84   : > { %p4361_p6 = pmov %p4359_p8 }
  0x85   : > { %3831 = dma.done.wait (%p4360_p13), [#allocation9], 3072  }
  0x86   : > { %3833 = vsyncadd (%p4361_p6), [#allocation9], 4294964224  ;;  %v3471_v0 = vld [vmem:[#allocation5 + $0x100] sm:$0xff]   ;;  %v3474_v3 = vld [vmem:[#allocation5 + $0x108] sm:$0xff]   ;;  %vm3863_vm1 = vmmov 0   ;;  %s339_s16 = scalar_lea.vmem [#allocation10], %s4107_s21 }
  0x87   : > { %v3472_v1 = vld [vmem:[#allocation5 + $0xc0] sm:$0xff]   ;;  %2919 = vmatprep.subr.bf16.mxu0 %v3471_v0  ;;  %v3475_v4 = vld [vmem:[#allocation5 + $0xc8] sm:$0xff]   ;;  %v3477_v6 = vld [vmem:[#allocation5 + $0x110] sm:$0xff]   ;;  %s2625_s10 = sshll.u32 %s339_s16, 4  ;;  %s2916_s12 = sshll.u32 %s3926_s28, 4  ;;  %s4293_s10 = int_to_ptr.vmem [resolvable:$true] %s2625_s10 }
  0x88   : > { %v3473_v2 = vld [vmem:[#allocation5 + $0x140] sm:$0xff]   ;;  %2920 = vmatpush3.bf16.msra.mxu0 %v3472_v1  ;;  %v3476_v5 = vld [vmem:[#allocation5 + $0x148] sm:$0xff]   ;;  %v3478_v7 = vld [vmem:[#allocation5 + $0xd0] sm:$0xff]   ;;  %s2613_s30 = scalar_lea.sflag [#allocation4], %s4107_s21  ;;  %s3778_s9 = scalar_lea.vmem %s4293_s10, 16 }
  0x89   : > { %3163 = vmatprep.subr.bf16.mxu1 %v3473_v2  ;;  %2921 = vmatprep.subr.bf16.mxu0 %v3474_v3  ;;  %v3479_v8 = vld [vmem:[#allocation5 + $0x150] sm:$0xff]   ;;  %v3480_v9 = vld [vmem:[#allocation5 + $0x118] sm:$0xff]   ;;  %v3483_v12 = vld [vmem:[#allocation5 + $0x120] sm:$0xff]   ;;  %p3779_p10 = scmp.ne.s32.totalorder %s4293_s10, %s3778_s9  ;;  %s3864_s28 = smov [#allocation10]  }
  0x8a   : > { %3164 = vmatpush3.bf16.msra.mxu1 %v3473_v2  ;;  %v3481_v10 = vld [vmem:[#allocation5 + $0xd8] sm:$0xff]   ;;  %v3485_v13 = vld [vmem:[#allocation5 + $0x160] sm:$0xff]   ;;  %v3486_v15 = vld [vmem:[#allocation5 + $0x128] sm:$0xff]   ;;  %s3782_s23 = sshll.u32 %s3864_s28, 4  ;;  %s3783_s23 = int_to_ptr.vmem [resolvable:$false] %s3782_s23 }
  0x8b   : > { %3165 = vmatprep.subr.bf16.mxu1 %v3476_v5  ;;  %v3482_v11 = vld [vmem:[#allocation5 + $0x158] sm:$0xff]   ;;  %v3484_v14 = vld [vmem:[#allocation5 + $0xe0] sm:$0xff]   ;;  %v3488_v16 = vld [vmem:[#allocation5 + $0x168] sm:$0xff]   ;;  %p3780_p3 = pnand %p3779_p10, %p4059_p5  ;;  %s3784_s29 = scalar_lea.vmem %s3783_s23, 32 }
  0x8c   : > { %2922 = vmatpush3.bf16.msra.mxu0 %v3475_v4  ;;  %v3487_v17 = vld [vmem:[#allocation5 + $0xe8] sm:$0xff]   ;;  %v3489_v18 = vld [vmem:[#allocation5 + $0x130] sm:$0xff]   ;;  %v3492_v21 = vld [vmem:[#allocation5 + $0x138] sm:$0xff]   ;;  %p3785_p12 = scmp.lt.s32.totalorder %s4293_s10, %s3783_s23  ;;  %p3786_p1 = scmp.lt.s32.totalorder %s3784_s29, %s3778_s9 }
  0x8d   : > { %2923 = vmatprep.subr.bf16.mxu0 %v3477_v6  ;;  %v3490_v19 = vld [vmem:[#allocation5 + $0xf0] sm:$0xff]   ;;  %v4126_v22 = vld [vmem:[%s4111_s20 + $0x4] ss:$12 sps:$4 sm:$0xff]   ;;  %v4133_v26 = vld [vmem:[%s4111_s20] ss:$12 sps:$4 sm:$0xff]   ;;  %p3781_p7 = pneg %p3780_p3 }
  0x8e   : > { %3166 = vmatpush3.bf16.msra.mxu1 %v3476_v5  ;;  %v3491_v20 = vld [vmem:[#allocation5 + $0x170] sm:$0xff]   ;;  %v3493_v23 = vld [vmem:[#allocation5 + $0xf8] sm:$0xff]   ;;  %650 = vmatprep.mubr.bf16.mxu0 %v4126_v22  ;;  %v3498_v27 = vld [vmem:[#allocation5 + $0x40] sm:$0xff]   ;;  %p3787_p2 = por %p3786_p1, %p3785_p12 }
  0x8f   : > { %3167 = vmatprep.subr.bf16.mxu1 %v3479_v8  ;;  %v3494_v24 = vld [vmem:[#allocation5 + $0x178] sm:$0xff]   ;;  %v4130_v25 = vld [vmem:[%s4111_s20 + $0x8] ss:$12 sps:$4 sm:$0xff]  }
  0x90   : > { %2924 = vmatpush3.bf16.msra.mxu0 %v3478_v7  ;;  %3179 = vmatprep.mubr.bf16.mxu1 %v4130_v25  ;;  %v3500_v28 = vld [vmem:[#allocation5] sm:$0xff]   ;;  %v4137_v30 = vld [vmem:[%s4111_s20 + $0x20] ss:$0 sps:$4 sm:$0xff]   ;;  %v3503_v31 = vld [vmem:[#allocation5 + $0x48] sm:$0xff]   ;;  %p3788_p4 = pnand %p3787_p2, %p3781_p7 }
  0x91   : > { %2925 = vmatprep.subr.bf16.mxu0 %v3480_v9  ;;  %v3502_v29 = vld [vmem:[#allocation5 + $0x80] sm:$0xff]   ;;  %v345_v32 = vld [vmem:[%s4111_s20 + $0x18] sm:$0xff]  ;;  %v3505_v33 = vld [vmem:[#allocation5 + $0x88] sm:$0xff]  }
  0x92   : > { %3168 = vmatpush3.bf16.msra.mxu1 %v3479_v8  ;;  %v4141_v34 = vcombine.high %v345_v32, %v345_v32  ;;  %v3504_v35 = vld [vmem:[#allocation5 + $0x8] sm:$0xff]   ;;  %v3508_v36 = vld [vmem:[#allocation5 + $0x50] sm:$0xff]   ;;  %v4145_v37 = vcombine.low %v345_v32, %v345_v32  ;;  %v3511_v40 = vld [vmem:[#allocation5 + $0x58] sm:$0xff]  }
  0x93   : > { %3169 = vmatprep.subr.bf16.mxu1 %v3482_v11  ;;  %v3510_v38 = vld [vmem:[#allocation5 + $0x90] sm:$0xff]   ;;  %v3513_v41 = vld [vmem:[#allocation5 + $0x98] sm:$0xff]   ;;  %v3514_v43 = vld [vmem:[#allocation5 + $0x60] sm:$0xff]  }
  0x94   : > { %2926 = vmatpush3.bf16.msra.mxu0 %v3481_v10  ;;  %v3509_v39 = vld [vmem:[#allocation5 + $0x10] sm:$0xff]   ;;  %v3512_v42 = vld [vmem:[#allocation5 + $0x18] sm:$0xff]   ;;  %v3516_v44 = vld [vmem:[#allocation5 + $0xa0] sm:$0xff]  }
  0x95   : > { %2927 = vmatprep.subr.bf16.mxu0 %v3483_v12  ;;  %v3515_v45 = vld [vmem:[#allocation5 + $0x20] sm:$0xff]   ;;  %v3517_v46 = vld [vmem:[#allocation5 + $0x68] sm:$0xff]   ;;  %v3520_v49 = vld [vmem:[#allocation5 + $0x70] sm:$0xff]  }
  0x96   : > { %3170 = vmatpush3.bf16.msra.mxu1 %v3482_v11  ;;  %v3519_v47 = vld [vmem:[#allocation5 + $0xa8] sm:$0xff]   ;;  %v3522_v50 = vld [vmem:[#allocation5 + $0xb0] sm:$0xff]   ;;  %v3523_v52 = vld [vmem:[#allocation5 + $0x78] sm:$0xff]  }
  0x97   : > { %3171 = vmatprep.subr.bf16.mxu1 %v3485_v13  ;;  %v3518_v48 = vld [vmem:[#allocation5 + $0x28] sm:$0xff]   ;;  %v3521_v51 = vld [vmem:[#allocation5 + $0x30] sm:$0xff]   ;;  %v3525_v53 = vld [vmem:[#allocation5 + $0xb8] sm:$0xff]  }
  0x98   : > { %2928 = vmatpush3.bf16.msra.mxu0 %v3484_v14  ;;  %v3524_v54 = vld [vmem:[#allocation5 + $0x38] sm:$0xff]   ;;  %v3526_v55 = vld [vmem:[#allocation5 + $0x1c0] sm:$0xff]   ;;  %v3529_v58 = vld [vmem:[#allocation5 + $0x1c8] sm:$0xff]  }
  0x99   : > { %2929 = vmatprep.subr.bf16.mxu0 %v3486_v15  ;;  %v3528_v56 = vld [vmem:[#allocation5 + $0x200] sm:$0xff]   ;;  %v3531_v59 = vld [vmem:[#allocation5 + $0x208] sm:$0xff]   ;;  %v3532_v61 = vld [vmem:[#allocation5 + $0x1d0] sm:$0xff]  }
  0x9a   : > { %3172 = vmatpush3.bf16.msra.mxu1 %v3485_v13  ;;  %v3527_v57 = vld [vmem:[#allocation5 + $0x180] sm:$0xff]   ;;  %v3530_v60 = vld [vmem:[#allocation5 + $0x188] sm:$0xff]   ;;  %v3534_v62 = vld [vmem:[#allocation5 + $0x210] sm:$0xff]  }
  0x9b   : > { %3173 = vmatprep.subr.bf16.mxu1 %v3488_v16  ;;  %v3533_v63 = vld [vmem:[#allocation5 + $0x190] sm:$0xff]   ;;  %v3535_v0 = vld [vmem:[#allocation5 + $0x1d8] sm:$0xff]   ;;  %v3538_v3 = vld [vmem:[#allocation5 + $0x1e0] sm:$0xff]  }
  0x9c   : > { %2930 = vmatpush3.bf16.msra.mxu0 %v3487_v17  ;;  %v3537_v1 = vld [vmem:[#allocation5 + $0x218] sm:$0xff]   ;;  %v3540_v4 = vld [vmem:[#allocation5 + $0x220] sm:$0xff]   ;;  %v3541_v6 = vld [vmem:[#allocation5 + $0x1e8] sm:$0xff]  }
  0x9d   : > { %2931 = vmatprep.subr.bf16.mxu0 %v3489_v18  ;;  %v3536_v2 = vld [vmem:[#allocation5 + $0x198] sm:$0xff]   ;;  %v3539_v5 = vld [vmem:[#allocation5 + $0x1a0] sm:$0xff]   ;;  %v3543_v7 = vld [vmem:[#allocation5 + $0x228] sm:$0xff]  }
  0x9e   : > { %3174 = vmatpush3.bf16.msra.mxu1 %v3488_v16  ;;  %v3542_v8 = vld [vmem:[#allocation5 + $0x1a8] sm:$0xff]   ;;  %v3544_v9 = vld [vmem:[#allocation5 + $0x1f0] sm:$0xff]   ;;  %v3547_v12 = vld [vmem:[#allocation5 + $0x1f8] sm:$0xff]  }
  0x9f   : > { %3175 = vmatprep.subr.bf16.mxu1 %v3491_v20  ;;  %v3546_v10 = vld [vmem:[#allocation5 + $0x230] sm:$0xff]   ;;  %v3549_v13 = vld [vmem:[#allocation5 + $0x238] sm:$0xff]   ;;  %v3550_v15 = vld [vmem:[#allocation5 + $0x280] sm:$0xff]  }
  0xa0   : > { %2932 = vmatpush3.bf16.msra.mxu0 %v3490_v19  ;;  %v3545_v11 = vld [vmem:[#allocation5 + $0x1b0] sm:$0xff]   ;;  %v3548_v14 = vld [vmem:[#allocation5 + $0x1b8] sm:$0xff]   ;;  %v3552_v16 = vld [vmem:[#allocation5 + $0x2c0] sm:$0xff]  }
  0xa1   : > { %2933 = vmatprep.subr.bf16.mxu0 %v3492_v21  ;;  %v3551_v17 = vld [vmem:[#allocation5 + $0x240] sm:$0xff]   ;;  %v3553_v18 = vld [vmem:[#allocation5 + $0x288] sm:$0xff]   ;;  %v3556_v21 = vld [vmem:[#allocation5 + $0x290] sm:$0xff]  }
  0xa2   : > { %3176 = vmatpush3.bf16.msra.mxu1 %v3491_v20  ;;  %v3555_v19 = vld [vmem:[#allocation5 + $0x2c8] sm:$0xff]   ;;  %v3564_v32 = vld [vmem:[#allocation5 + $0x2e0] sm:$0xff]  }
  0xa3   : > { %3177 = vmatprep.subr.bf16.mxu1 %v3494_v24  ;;  %v3554_v20 = vld [vmem:[#allocation5 + $0x248] sm:$0xff]  }
  0xa4   : > { %2934 = vmatpush3.bf16.msra.mxu0 %v3493_v23  ;;  %v3558_v23 = vld [vmem:[#allocation5 + $0x2d0] sm:$0xff]  }
  0xa5   : > { %2957 = vmatprep.subr.bf16.mxu0 %v3498_v27  ;;  %v3559_v27 = vld [vmem:[#allocation5 + $0x298] sm:$0xff]  }
  0xa6   : > { %3178 = vmatpush3.bf16.msra.mxu1 %v3494_v24  ;;  %v3557_v24 = vld [vmem:[#allocation5 + $0x250] sm:$0xff]  }
  0xa7   : > { %651 = vmatmul.mubr.bf16.vlgmr.msra.gmra.mrb[0].mxu0 %v4133_v26  ;;  %3183 = vmatprep.subr.bf16.mxu1 %v3502_v29 }
  0xa8   : > { %2958 = vmatpush3.bf16.msra.mxu0 %v3500_v28  ;;  %658 = vmatprep.mubr.bf16.mxu0 %v4141_v34  ;;  %v3561_v28 = vld [vmem:[#allocation5 + $0x2d8] sm:$0xff]  }
  0xa9   : > { %3180 = vmatmul.mubr.bf16.vlgmr.msra.gmra.mrb[0].mxu1 %v4137_v30  ;;  %2959 = vmatprep.subr.bf16.mxu0 %v3503_v31  ;;  %v3562_v31 = vld [vmem:[#allocation5 + $0x2a0] sm:$0xff]  }
  0xaa   : > { %3184 = vmatpush3.bf16.msra.mxu1 %v3502_v29  ;;  %3199 = vmatprep.mubr.bf16.mxu1 %v4130_v25  ;;  %v3560_v29 = vld [vmem:[#allocation5 + $0x258] sm:$0xff]  }
  0xab   : > { %3185 = vmatprep.subr.bf16.mxu1 %v3505_v33 }
  0xac   : > { %2960 = vmatpush3.bf16.msra.mxu0 %v3504_v35  ;;  %v3565_v35 = vld [vmem:[#allocation5 + $0x2a8] sm:$0xff]  }
  0xad   : > { %2961 = vmatprep.subr.bf16.mxu0 %v3508_v36  ;;  %v3567_v36 = vld [vmem:[#allocation5 + $0x2e8] sm:$0xff]  }
  0xae   : > { %3186 = vmatpush3.bf16.msra.mxu1 %v3505_v33  ;;  %v3563_v33 = vld [vmem:[#allocation5 + $0x260] sm:$0xff]  }
  0xaf   : > { %659 = vmatmul.mubr.bf16.gmra.mrb[4].mxu0 %v4145_v37  ;;  %3187 = vmatprep.subr.bf16.mxu1 %v3510_v38 }
  0xb0   : > { %2962 = vmatpush3.bf16.msra.mxu0 %v3509_v39  ;;  %896 = vmatprep.mubr.bf16.mxu0 %v4126_v22  ;;  %v3568_v39 = vld [vmem:[#allocation5 + $0x2b0] sm:$0xff]  }
  0xb1   : > { %2963 = vmatprep.subr.bf16.mxu0 %v3511_v40  ;;  %v3570_v40 = vld [vmem:[#allocation5 + $0x2f0] sm:$0xff]  }
  0xb2   : > { %3188 = vmatpush3.bf16.msra.mxu1 %v3510_v38  ;;  %v3566_v38 = vld [vmem:[#allocation5 + $0x268] sm:$0xff]  }
  0xb3   : > { %3189 = vmatprep.subr.bf16.mxu1 %v3513_v41 }
  0xb4   : > { %2964 = vmatpush3.bf16.msra.mxu0 %v3512_v42  ;;  %v3571_v42 = vld [vmem:[#allocation5 + $0x2b8] sm:$0xff]  }
  0xb5   : > { %2965 = vmatprep.subr.bf16.mxu0 %v3514_v43  ;;  %v3572_v43 = vld [vmem:[#allocation5 + $0x278] sm:$0xff]  }
  0xb6   : > { %3190 = vmatpush3.bf16.msra.mxu1 %v3513_v41  ;;  %v3569_v41 = vld [vmem:[#allocation5 + $0x270] sm:$0xff]  }
  0xb7   : > { %3191 = vmatprep.subr.bf16.mxu1 %v3516_v44 }
  0xb8   : > { %2966 = vmatpush3.bf16.msra.mxu0 %v3515_v45  ;;  %v3574_v45 = vld [vmem:[#allocation5 + $0x340] sm:$0xff]  }
  0xb9   : > { %2967 = vmatprep.subr.bf16.mxu0 %v3517_v46  ;;  %v3576_v46 = vld [vmem:[#allocation5 + $0x380] sm:$0xff]  }
  0xba   : > { %3192 = vmatpush3.bf16.msra.mxu1 %v3516_v44  ;;  %v3573_v44 = vld [vmem:[#allocation5 + $0x2f8] sm:$0xff]  }
  0xbb   : > { %3193 = vmatprep.subr.bf16.mxu1 %v3519_v47 }
  0xbc   : > { %2968 = vmatpush3.bf16.msra.mxu0 %v3518_v48  ;;  %v3577_v48 = vld [vmem:[#allocation5 + $0x348] sm:$0xff]  }
  0xbd   : > { %2969 = vmatprep.subr.bf16.mxu0 %v3520_v49  ;;  %v3579_v49 = vld [vmem:[#allocation5 + $0x388] sm:$0xff]  }
  0xbe   : > { %3194 = vmatpush3.bf16.msra.mxu1 %v3519_v47  ;;  %v3575_v47 = vld [vmem:[#allocation5 + $0x300] sm:$0xff]  }
  0xbf   : > { %3195 = vmatprep.subr.bf16.mxu1 %v3522_v50 }
  0xc0   : > { %2970 = vmatpush3.bf16.msra.mxu0 %v3521_v51  ;;  %v3580_v51 = vld [vmem:[#allocation5 + $0x350] sm:$0xff]  }
  0xc1   : > { %2971 = vmatprep.subr.bf16.mxu0 %v3523_v52  ;;  %v3582_v52 = vld [vmem:[#allocation5 + $0x390] sm:$0xff]  }
  0xc2   : > { %3196 = vmatpush3.bf16.msra.mxu1 %v3522_v50  ;;  %v3578_v50 = vld [vmem:[#allocation5 + $0x308] sm:$0xff]  }
  0xc3   : > { %3197 = vmatprep.subr.bf16.mxu1 %v3525_v53 }
  0xc4   : > { %2972 = vmatpush3.bf16.msra.mxu0 %v3524_v54  ;;  %v3583_v54 = vld [vmem:[#allocation5 + $0x358] sm:$0xff]  }
  0xc5   : > { %2995 = vmatprep.subr.bf16.mxu0 %v3526_v55  ;;  %v3585_v55 = vld [vmem:[#allocation5 + $0x398] sm:$0xff]  }
  0xc6   : > { %3198 = vmatpush3.bf16.msra.mxu1 %v3525_v53  ;;  %v3581_v53 = vld [vmem:[#allocation5 + $0x310] sm:$0xff]  }
  0xc7   : > { %897 = vmatmul.mubr.bf16.vlgmr.msra.gmra.mrb[8].mxu0 %v4133_v26  ;;  %3203 = vmatprep.subr.bf16.mxu1 %v3528_v56 }
  0xc8   : > { %2996 = vmatpush3.bf16.msra.mxu0 %v3527_v57  ;;  %904 = vmatprep.mubr.bf16.mxu0 %v4141_v34  ;;  %v3587_v57 = vld [vmem:[#allocation5 + $0x320] sm:$0xff]  }
  0xc9   : > { %3200 = vmatmul.mubr.bf16.vlgmr.msra.gmra.mrb[4].mxu1 %v4137_v30  ;;  %2997 = vmatprep.subr.bf16.mxu0 %v3529_v58  ;;  %v3591_v58 = vld [vmem:[#allocation5 + $0x3a8] sm:$0xff]  }
  0xca   : > { %3204 = vmatpush3.bf16.msra.mxu1 %v3528_v56  ;;  %3219 = vmatprep.mubr.bf16.mxu1 %v4130_v25  ;;  %v3586_v56 = vld [vmem:[#allocation5 + $0x360] sm:$0xff]  }
  0xcb   : > { %3205 = vmatprep.subr.bf16.mxu1 %v3531_v59 }
  0xcc   : > { %2998 = vmatpush3.bf16.msra.mxu0 %v3530_v60  ;;  %v3592_v60 = vld [vmem:[#allocation5 + $0x370] sm:$0xff]  }
  0xcd   : > { %2999 = vmatprep.subr.bf16.mxu0 %v3532_v61  ;;  %v3594_v61 = vld [vmem:[#allocation5 + $0x3b0] sm:$0xff]  }
  0xce   : > { %3206 = vmatpush3.bf16.msra.mxu1 %v3531_v59  ;;  %v3590_v59 = vld [vmem:[#allocation5 + $0x328] sm:$0xff]  }
  0xcf   : > { %3207 = vmatprep.subr.bf16.mxu1 %v3534_v62  ;;  %905 = vmatmul.mubr.bf16.gmra.mrb[12].mxu0 %v4145_v37 }
  0xd0   : > { %3000 = vmatpush3.bf16.msra.mxu0 %v3533_v63  ;;  %1183 = vmatprep.mubr.bf16.mxu0 %v4126_v22  ;;  %v3597_v63 = vld [vmem:[#allocation5 + $0x3b8] sm:$0xff]  }
  0xd1   : > { %3001 = vmatprep.subr.bf16.mxu0 %v3535_v0  ;;  %v3596_v0 = vld [vmem:[#allocation5 + $0x338] sm:$0xff]  }
  0xd2   : > { %3208 = vmatpush3.bf16.msra.mxu1 %v3534_v62  ;;  %v3593_v62 = vld [vmem:[#allocation5 + $0x330] sm:$0xff]  }
  0xd3   : > { %3209 = vmatprep.subr.bf16.mxu1 %v3537_v1 }
  0xd4   : > { %3002 = vmatpush3.bf16.msra.mxu0 %v3536_v2  ;;  %v3663_v2 = vld [vmem:[%s4111_s20 + $0x20] ss:$0 sps:$4 sm:$0xff]  }
  0xd5   : > { %3003 = vmatprep.subr.bf16.mxu0 %v3538_v3  ;;  %v347_v3 = vlaneseq }
  0xd6   : > { %3210 = vmatpush3.bf16.msra.mxu1 %v3537_v1  ;;  %v3662_v1 = vld [vmem:[%s4111_s20] ss:$12 sps:$4 sm:$0xff]   ;;  %s4291_s20 = scalar_lea.hbm %s4342_s7, %s2916_s12 }
  0xd7   : > { %3211 = vmatprep.subr.bf16.mxu1 %v3540_v4 }
  0xd8   : > { %3004 = vmatpush3.bf16.msra.mxu0 %v3539_v5 }
  0xd9   : > { %3005 = vmatprep.subr.bf16.mxu0 %v3541_v6 }
  0xda   : > { %3212 = vmatpush3.bf16.msra.mxu1 %v3540_v4 }
  0xdb   : > { %3213 = vmatprep.subr.bf16.mxu1 %v3543_v7 }
  0xdc   : > { %3006 = vmatpush3.bf16.msra.mxu0 %v3542_v8 }
  0xdd   : > { %3007 = vmatprep.subr.bf16.mxu0 %v3544_v9 }
  0xde   : > { %3214 = vmatpush3.bf16.msra.mxu1 %v3543_v7 }
  0xdf   : > { %3215 = vmatprep.subr.bf16.mxu1 %v3546_v10 }
  0xe0   : > { %3008 = vmatpush3.bf16.msra.mxu0 %v3545_v11  ;;  %v4172_v11 = vshrl.u32 %v347_v3, 7 }
  0xe1   : > { %3009 = vmatprep.subr.bf16.mxu0 %v3547_v12 }
  0xe2   : > { %3216 = vmatpush3.bf16.msra.mxu1 %v3546_v10  ;;  %vm717_vm0 = vcmp.lt.s32.totalorder %v4172_v11, 7  ;;  %vm1250_vm2 = vcmp.lt.s32.totalorder %v4172_v11, 6  ;;  %vm1547_vm3 = vcmp.lt.s32.totalorder %v4172_v11, 5  ;;  %vm1844_vm4 = vcmp.lt.s32.totalorder %v4172_v11, 4 }
  0xe3   : > { %3217 = vmatprep.subr.bf16.mxu1 %v3549_v13  ;;  %vm1974_vm7 = vcmp.lt.s32.totalorder %v4172_v11, 2  ;;  %vm2090_vm8 = vcmp.lt.s32.totalorder %v4172_v11, 1 }
  0xe4   : > { %3010 = vmatpush3.bf16.msra.mxu0 %v3548_v14 }
  0xe5   : > { %3033 = vmatprep.subr.bf16.mxu0 %v3550_v15 }
  0xe6   : > { %3218 = vmatpush3.bf16.msra.mxu1 %v3549_v13 }
  0xe7   : > { %1184 = vmatmul.mubr.bf16.vlgmr.msra.gmra.mrb[16].mxu0 %v4133_v26  ;;  %3223 = vmatprep.subr.bf16.mxu1 %v3552_v16 }
  0xe8   : > { %3034 = vmatpush3.bf16.msra.mxu0 %v3551_v17  ;;  %1191 = vmatprep.mubr.bf16.mxu0 %v4141_v34  ;;  %v3862_v17 = vmov 0.0  }
  0xe9   : > { %3220 = vmatmul.mubr.bf16.vlgmr.msra.gmra.mrb[8].mxu1 %v4137_v30  ;;  %3035 = vmatprep.subr.bf16.mxu0 %v3553_v18 }
  0xea   : > { %3224 = vmatpush3.bf16.msra.mxu1 %v3552_v16  ;;  %3239 = vmatprep.mubr.bf16.mxu1 %v4130_v25  ;;  %v3598_v16 = vld [vmem:[#allocation7] sm:$0xff]  }
  0xeb   : > { %3225 = vmatprep.subr.bf16.mxu1 %v3555_v19 }
  0xec   : > { %3036 = vmatpush3.bf16.msra.mxu0 %v3554_v20 }
  0xed   : > { %3037 = vmatprep.subr.bf16.mxu0 %v3556_v21 }
  0xee   : > { %3226 = vmatpush3.bf16.msra.mxu1 %v3555_v19 }
  0xef   : > { %1192 = vmatmul.mubr.bf16.gmra.mrb[20].mxu0 %v4145_v37  ;;  %3227 = vmatprep.subr.bf16.mxu1 %v3558_v23 }
  0xf0   : > { %3038 = vmatpush3.bf16.msra.mxu0 %v3557_v24  ;;  %1480 = vmatprep.mubr.bf16.mxu0 %v4126_v22 }
  0xf1   : > { %3039 = vmatprep.subr.bf16.mxu0 %v3559_v27 }
  0xf2   : > { %3228 = vmatpush3.bf16.msra.mxu1 %v3558_v23  ;;  %v3600_v23 = vld [vmem:[#allocation7 + $0x8] sm:$0xff]  }
  0xf3   : > { %3229 = vmatprep.subr.bf16.mxu1 %v3561_v28 }
  0xf4   : > { %3040 = vmatpush3.bf16.msra.mxu0 %v3560_v29  ;;  %v3601_v29 = vld [vmem:[#allocation7 + $0x48] sm:$0xff]  }
  0xf5   : > { %3041 = vmatprep.subr.bf16.mxu0 %v3562_v31 }
  0xf6   : > { %3230 = vmatpush3.bf16.msra.mxu1 %v3561_v28 }
  0xf7   : > { %3231 = vmatprep.subr.bf16.mxu1 %v3564_v32 }
  0xf8   : > { %3042 = vmatpush3.bf16.msra.mxu0 %v3563_v33  ;;  %v3602_v33 = vld [vmem:[#allocation7 + $0x10] sm:$0xff]  }
  0xf9   : > { %3043 = vmatprep.subr.bf16.mxu0 %v3565_v35 }
  0xfa   : > { %3232 = vmatpush3.bf16.msra.mxu1 %v3564_v32 }
  0xfb   : > { %3233 = vmatprep.subr.bf16.mxu1 %v3567_v36 }
  0xfc   : > { %3044 = vmatpush3.bf16.msra.mxu0 %v3566_v38 }
  0xfd   : > { %3045 = vmatprep.subr.bf16.mxu0 %v3568_v39  ;;  %v3604_v39 = vld [vmem:[#allocation7 + $0x18] sm:$0xff]  }
  0xfe   : > { %3234 = vmatpush3.bf16.msra.mxu1 %v3567_v36  ;;  %v3603_v36 = vld [vmem:[#allocation7 + $0x50] sm:$0xff]  }
  0xff   : > { %3235 = vmatprep.subr.bf16.mxu1 %v3570_v40 }
 0x100   : > { %3046 = vmatpush3.bf16.msra.mxu0 %v3569_v41  ;;  %v3606_v41 = vld [vmem:[#allocation7 + $0x20] sm:$0xff]  }
 0x101   : > { %3047 = vmatprep.subr.bf16.mxu0 %v3571_v42  ;;  %v3607_v42 = vld [vmem:[#allocation7 + $0x60] sm:$0xff]  }
 0x102   : > { %3236 = vmatpush3.bf16.msra.mxu1 %v3570_v40  ;;  %v3605_v40 = vld [vmem:[#allocation7 + $0x58] sm:$0xff]  }
 0x103   : > { %3237 = vmatprep.subr.bf16.mxu1 %v3573_v44 }
 0x104   : > { %3048 = vmatpush3.bf16.msra.mxu0 %v3572_v43  ;;  %v3608_v43 = vld [vmem:[#allocation7 + $0x28] sm:$0xff]  }
 0x105   : > { %3071 = vmatprep.subr.bf16.mxu0 %v3574_v45  ;;  %v3610_v45 = vld [vmem:[#allocation7 + $0x30] sm:$0xff]  }
 0x106   : > { %3238 = vmatpush3.bf16.msra.mxu1 %v3573_v44  ;;  %v3609_v44 = vld [vmem:[#allocation7 + $0x68] sm:$0xff]  }
 0x107   : > { %1481 = vmatmul.mubr.bf16.vlgmr.msra.gmra.mrb[24].mxu0 %v4133_v26  ;;  %3243 = vmatprep.subr.bf16.mxu1 %v3576_v46  ;;  %v3584_v26 = vld [vmem:[#allocation5 + $0x318] sm:$0xff]  }
 0x108   : > { %3072 = vmatpush3.bf16.msra.mxu0 %v3575_v47  ;;  %1488 = vmatprep.mubr.bf16.mxu0 %v4141_v34  ;;  %v3612_v47 = vld [vmem:[#allocation7 + $0x38] sm:$0xff]  }
 0x109   : > { %3240 = vmatmul.mubr.bf16.vlgmr.msra.gmra.mrb[12].mxu1 %v4137_v30  ;;  %3073 = vmatprep.subr.bf16.mxu0 %v3577_v48  ;;  %v3588_v30 = vld [vmem:[#allocation5 + $0x3a0] sm:$0xff]  }
 0x10a   : > { %3244 = vmatpush3.bf16.msra.mxu1 %v3576_v46  ;;  %3259 = vmatprep.mubr.bf16.mxu1 %v4130_v25  ;;  %v3589_v25 = vld [vmem:[#allocation5 + $0x368] sm:$0xff]   ;;  %v3611_v46 = vld [vmem:[#allocation7 + $0x70] sm:$0xff]  }
 0x10b   : > { %3245 = vmatprep.subr.bf16.mxu1 %v3579_v49 }
 0x10c   : > { %3074 = vmatpush3.bf16.msra.mxu0 %v3578_v50 }
 0x10d   : > { %3075 = vmatprep.subr.bf16.mxu0 %v3580_v51 }
 0x10e   : > { %3246 = vmatpush3.bf16.msra.mxu1 %v3579_v49  ;;  %v3613_v49 = vld [vmem:[#allocation7 + $0x78] sm:$0xff]  }
 0x10f   : > { %1489 = vmatmul.mubr.bf16.gmra.mrb[28].mxu0 %v4145_v37  ;;  %3247 = vmatprep.subr.bf16.mxu1 %v3582_v52 }
 0x110   : > { %3076 = vmatpush3.bf16.msra.mxu0 %v3581_v53  ;;  %1777 = vmatprep.mubr.bf16.mxu0 %v4126_v22  ;;  %v3595_v22 = vld [vmem:[#allocation5 + $0x378] sm:$0xff]  }
 0x111   : > { %3077 = vmatprep.subr.bf16.mxu0 %v3583_v54 }
 0x112   : > { %3248 = vmatpush3.bf16.msra.mxu1 %v3582_v52 }
 0x113   : > { %3249 = vmatprep.subr.bf16.mxu1 %v3585_v55 }
 0x114   : > { %3078 = vmatpush3.bf16.msra.mxu0 %v3584_v26 }
 0x115   : > { %3079 = vmatprep.subr.bf16.mxu0 %v3586_v56 }
 0x116   : > { %3250 = vmatpush3.bf16.msra.mxu1 %v3585_v55 }
 0x117   : > { %3251 = vmatprep.subr.bf16.mxu1 %v3588_v30 }
 0x118   : > { %3080 = vmatpush3.bf16.msra.mxu0 %v3587_v57 }
 0x119   : > { %3081 = vmatprep.subr.bf16.mxu0 %v3589_v25 }
 0x11a   : > { %3252 = vmatpush3.bf16.msra.mxu1 %v3588_v30 }
 0x11b   : > { %3253 = vmatprep.subr.bf16.mxu1 %v3591_v58 }
 0x11c   : > { %3082 = vmatpush3.bf16.msra.mxu0 %v3590_v59 }
 0x11d   : > { %3083 = vmatprep.subr.bf16.mxu0 %v3592_v60 }
 0x11e   : > { %3254 = vmatpush3.bf16.msra.mxu1 %v3591_v58 }
 0x11f   : > { %3255 = vmatprep.subr.bf16.mxu1 %v3594_v61 }
 0x120   : > { %3084 = vmatpush3.bf16.msra.mxu0 %v3593_v62 }
 0x121   : > { %3085 = vmatprep.subr.bf16.mxu0 %v3595_v22 }
 0x122   : > { %3256 = vmatpush3.bf16.msra.mxu1 %v3594_v61 }
 0x123   : > { %3257 = vmatprep.subr.bf16.mxu1 %v3597_v63 }
 0x124   : > { %3086 = vmatpush3.bf16.msra.mxu0 %v3596_v0 }
 0x125   : > { %3263 = vmatprep.subr.bf16.mxu0 %v3862_v17 }
 0x126   : > { %3258 = vmatpush3.bf16.msra.mxu1 %v3597_v63 }
 0x127   : > { %1778 = vmatmul.mubr.bf16.vlgmr.msra.gmra.mrb[32].mxu0 %v3662_v1  ;;  %3283 = vmatprep.subr.bf16.mxu1 %v3862_v17 }
 0x128   : > { %1785 = vmatprep.mubr.bf16.mxu0 %v4141_v34  ;;  %3264 = vmatpush3.bf16.msra.mxu0 %v3598_v16 }
 0x129   : > { %3260 = vmatmul.mubr.bf16.vlgmr.msra.gmra.mrb[16].mxu1 %v3663_v2  ;;  %3265 = vmatprep.subr.bf16.mxu0 %v3862_v17 }
 0x12a   : > { %3299 = vmatprep.mubr.msk.bf16.mxu1 %vm3863_vm1, %v3862_v17 }
 0x12c   : > { %3266 = vmatpush3.bf16.msra.mxu0 %v3600_v23 }
 0x12d   : > { %3267 = vmatprep.subr.bf16.mxu0 %v3862_v17 }
 0x12f   : > { %1786 = vmatmul.mubr.bf16.gmra.mrb[36].mxu0 %v4145_v37  ;;  %v3599_v37 = vld [vmem:[#allocation7 + $0x40] sm:$0xff]  }
 0x130   : > { %3284 = vmatpush3.bf16.msra.mxu1 %v3599_v37  ;;  %3268 = vmatpush3.bf16.msra.mxu0 %v3602_v33 }
 0x131   : > { %3285 = vmatprep.subr.bf16.mxu1 %v3862_v17  ;;  %3269 = vmatprep.subr.bf16.mxu0 %v3862_v17 }
 0x132   : > { %3279 = vmatprep.mubr.msk.bf16.mxu0 %vm3863_vm1, %v3862_v17 }
 0x134   : > { %3286 = vmatpush3.bf16.msra.mxu1 %v3601_v29  ;;  %3270 = vmatpush3.bf16.msra.mxu0 %v3604_v39 }
 0x135   : > { %3287 = vmatprep.subr.bf16.mxu1 %v3862_v17  ;;  %3271 = vmatprep.subr.bf16.mxu0 %v3862_v17 }
 0x138   : > { %3288 = vmatpush3.bf16.msra.mxu1 %v3603_v36  ;;  %3272 = vmatpush3.bf16.msra.mxu0 %v3606_v41 }
 0x139   : > { %3289 = vmatprep.subr.bf16.mxu1 %v3862_v17  ;;  %3273 = vmatprep.subr.bf16.mxu0 %v3862_v17 }
 0x13c   : > { %3290 = vmatpush3.bf16.msra.mxu1 %v3605_v40  ;;  %3274 = vmatpush3.bf16.msra.mxu0 %v3608_v43 }
 0x13d   : > { %3291 = vmatprep.subr.bf16.mxu1 %v3862_v17  ;;  %3275 = vmatprep.subr.bf16.mxu0 %v3862_v17 }
 0x140   : > { %3292 = vmatpush3.bf16.msra.mxu1 %v3607_v42  ;;  %3276 = vmatpush3.bf16.msra.mxu0 %v3610_v45 }
 0x141   : > { %3293 = vmatprep.subr.bf16.mxu1 %v3862_v17  ;;  %3277 = vmatprep.subr.bf16.mxu0 %v3862_v17 }
 0x144   : > { %3294 = vmatpush3.bf16.msra.mxu1 %v3609_v44  ;;  %3278 = vmatpush3.bf16.msra.mxu0 %v3612_v47 }
 0x145   : > { %3295 = vmatprep.subr.bf16.mxu1 %v3862_v17  ;;  %3303 = vmatprep.subr.bf16.mxu0 %v3862_v17 }
 0x148   : > { %3296 = vmatpush3.bf16.msra.mxu1 %v3611_v46 }
 0x149   : > { %3297 = vmatprep.subr.bf16.mxu1 %v3862_v17 }
 0x14c   : > { %3298 = vmatpush3.bf16.msra.mxu1 %v3613_v49 }
 0x14d   : > { %3323 = vmatprep.subr.bf16.mxu1 %v3862_v17 }
 0x17a   : > { %v2935_v4 = vpop.f32.mrb[0].mxu0 }
 0x17b   : > { %v2936_v5 = vpop.f32.mrb[1].mxu0 }
 0x17c   : > { %v2937_v6 = vadd.f32 %v2936_v5, %v2935_v4  ;;  %v2938_v7 = vpop.f32.mrb[2].mxu0  ;;  %v3181_v8 = vpop.f32.mrb[0].mxu1 }
 0x17d   : > { %v2939_v9 = vpop.f32.mrb[3].mxu0  ;;  %v700_v10 = vpop.f32.mrb[1].mxu1 }
 0x17e   : > { %v2940_v12 = vadd.f32 %v2939_v9, %v2938_v7  ;;  %v701_v13 = vadd.f32 %v2937_v6, %v700_v10  ;;  %v3182_v14 = vpop.f32.mrb[2].mxu1 }
 0x17f   : > { %v703_v15 = vpop.f32.mrb[3].mxu1 }
 0x180   : > { %v704_v34 = vadd.f32 %v2940_v12, %v703_v15  ;;  %v714_v18 = vrot.slane %v701_v13, 1 }
 0x182   : > { %v715_v19 = vrot.slane %v704_v34, 1  ;;  %v2941_v20 = vpop.f32.mrb[4].mxu0 }
 0x183   : > { %v2942_v21 = vpop.f32.mrb[5].mxu0 }
 0x184   : > { %v2943_v24 = vadd.f32 %v2942_v21, %v2941_v20  ;;  %v2944_v27 = vpop.f32.mrb[6].mxu0  ;;  %v719_v28 = vsel %vm717_vm0, %v714_v18, %v715_v19 }
 0x185   : > { %v2945_v31 = vpop.f32.mrb[7].mxu0 }
 0x186   : > { %v709_v32 = vadd.f32 %v3181_v8, %v2943_v24 }
 0x188   : > { %v716_v35 = vrot.slane %v709_v32, 1 }
 0x18a   : > { %v718_v38 = vsel %vm717_vm0, %v715_v19, %v716_v35 }
 0x19a   : > { %v2973_v48 = vpop.f32.mrb[8].mxu0 }
 0x19b   : > { %v2974_v50 = vpop.f32.mrb[9].mxu0 }
 0x19c   : > { %v2975_v51 = vadd.f32 %v2974_v50, %v2973_v48  ;;  %v2976_v52 = vpop.f32.mrb[10].mxu0  ;;  %v3201_v53 = vpop.f32.mrb[4].mxu1 }
 0x19d   : > { %v2977_v54 = vpop.f32.mrb[11].mxu0  ;;  %v945_v55 = vpop.f32.mrb[5].mxu1 }
 0x19e   : > { %v2978_v26 = vadd.f32 %v2977_v54, %v2976_v52  ;;  %v899_v56 = vadd.f32 %v2975_v51, %v719_v28  ;;  %v3202_v30 = vpop.f32.mrb[6].mxu1 }
 0x19f   : > { %v948_v57 = vpop.f32.mrb[7].mxu1 }
 0x1a0   : > { %v946_v25 = vadd.f32 %v945_v55, %v899_v56  ;;  %v902_v58 = vadd.f32 %v2978_v26, %v718_v38 }
 0x1a2   : > { %v949_v59 = vadd.f32 %v948_v57, %v902_v58  ;;  %v2979_v60 = vpop.f32.mrb[12].mxu0 }
 0x1a3   : > { %v2980_v61 = vpop.f32.mrb[13].mxu0 }
 0x1a4   : > { %v2982_v62 = vpop.f32.mrb[14].mxu0 }
 0x1a5   : > { %v2983_v22 = vpop.f32.mrb[15].mxu0 }
 0x1ba   : > { %v3011_v63 = vpop.f32.mrb[16].mxu0 }
 0x1bb   : > { %v3012_v0 = vpop.f32.mrb[17].mxu0 }
 0x1bc   : > { %v3013_v1 = vadd.f32 %v3012_v0, %v3011_v63  ;;  %v3014_v2 = vpop.f32.mrb[18].mxu0  ;;  %v3221_v3 = vpop.f32.mrb[8].mxu1 }
 0x1bd   : > { %v3015_v4 = vpop.f32.mrb[19].mxu0  ;;  %v1233_v5 = vpop.f32.mrb[9].mxu1 }
 0x1be   : > { %v3016_v6 = vadd.f32 %v3015_v4, %v3014_v2  ;;  %v1234_v7 = vadd.f32 %v3013_v1, %v1233_v5  ;;  %v3222_v8 = vpop.f32.mrb[10].mxu1  ;;  %v2857_v4 = vld [vmem:[%s4337_s2] ss:$0 sm:$0xff] }
 0x1bf   : > { %v1236_v9 = vpop.f32.mrb[11].mxu1 }
 0x1c0   : > { %v1237_v10 = vadd.f32 %v3016_v6, %v1236_v9  ;;  %v1247_v12 = vrot.slane %v1234_v7, 2 }
 0x1c2   : > { %v1248_v13 = vrot.slane %v1237_v10, 2  ;;  %v3017_v14 = vpop.f32.mrb[20].mxu0 }
 0x1c3   : > { %v3018_v15 = vpop.f32.mrb[21].mxu0 }
 0x1c4   : > { %v1252_v16 = vsel %vm1250_vm2, %v1247_v12, %v1248_v13  ;;  %v3019_v34 = vadd.f32 %v3018_v15, %v3017_v14  ;;  %v3020_v37 = vpop.f32.mrb[22].mxu0 }
 0x1c5   : > { %v1253_v18 = vadd.f32 %v1252_v16, %v946_v25  ;;  %v3021_v19 = vpop.f32.mrb[23].mxu0 }
 0x1c6   : > { %v1242_v20 = vadd.f32 %v3221_v3, %v3019_v34 }
 0x1c8   : > { %v1249_v21 = vrot.slane %v1242_v20, 2 }
 0x1ca   : > { %v1251_v23 = vsel %vm1250_vm2, %v1248_v13, %v1249_v21 }
 0x1cb   : > { %v1254_v24 = vadd.f32 %v1251_v23, %v949_v59 }
 0x1da   : > { %v3049_v27 = vpop.f32.mrb[24].mxu0 }
 0x1db   : > { %v3050_v28 = vpop.f32.mrb[25].mxu0 }
 0x1dc   : > { %v3051_v29 = vadd.f32 %v3050_v28, %v3049_v27  ;;  %v3052_v31 = vpop.f32.mrb[26].mxu0  ;;  %v3241_v32 = vpop.f32.mrb[12].mxu1  ;;  %v3615_v28 = vld [vmem:[#allocation7 + $0x88] sm:$0xff]  }
 0x1dd   : > { %v3053_v33 = vpop.f32.mrb[27].mxu0  ;;  %v1530_v35 = vpop.f32.mrb[13].mxu1 }
 0x1de   : > { %v3054_v36 = vadd.f32 %v3053_v33, %v3052_v31  ;;  %v1531_v38 = vadd.f32 %v3051_v29, %v1530_v35  ;;  %v3242_v39 = vpop.f32.mrb[14].mxu1  ;;  %v3616_v29 = vld [vmem:[#allocation7 + $0x90] sm:$0xff]   ;;  %v3617_v31 = vld [vmem:[#allocation7 + $0x98] sm:$0xff]   ;;  %v3619_v33 = vld [vmem:[#allocation7 + $0xa8] sm:$0xff]  }
 0x1df   : > { %v1533_v40 = vpop.f32.mrb[15].mxu1  ;;  %v3620_v35 = vld [vmem:[#allocation7 + $0xb0] sm:$0xff]   ;;  %v3623_v39 = vld [vmem:[#allocation8 + $0x40] sm:$0xff]  }
 0x1e0   : > { %v1534_v41 = vadd.f32 %v3054_v36, %v1533_v40  ;;  %v1544_v42 = vrot.slane %v1531_v38, 3  ;;  %v3621_v36 = vld [vmem:[#allocation7 + $0xb8] sm:$0xff]   ;;  %v3622_v38 = vld [vmem:[#allocation8] sm:$0xff]   ;;  %v3624_v40 = vld [vmem:[#allocation8 + $0x8] sm:$0xff]  }
 0x1e2   : > { %v1545_v43 = vrot.slane %v1534_v41, 3  ;;  %v3055_v44 = vpop.f32.mrb[28].mxu0  ;;  %v3625_v41 = vld [vmem:[#allocation8 + $0x48] sm:$0xff]  }
 0x1e3   : > { %v3056_v45 = vpop.f32.mrb[29].mxu0 }
 0x1e4   : > { %v1549_v46 = vsel %vm1547_vm3, %v1544_v42, %v1545_v43  ;;  %v3057_v47 = vadd.f32 %v3056_v45, %v3055_v44  ;;  %v3058_v48 = vpop.f32.mrb[30].mxu0  ;;  %v3626_v42 = vld [vmem:[#allocation8 + $0x10] sm:$0xff]   ;;  %v3628_v44 = vld [vmem:[#allocation8 + $0x18] sm:$0xff]  }
 0x1e5   : > { %v1550_v49 = vadd.f32 %v1549_v46, %v1253_v18  ;;  %v3059_v50 = vpop.f32.mrb[31].mxu0  ;;  %v3629_v45 = vld [vmem:[#allocation8 + $0x58] sm:$0xff]   ;;  %v3630_v46 = vld [vmem:[#allocation8 + $0x20] sm:$0xff]   ;;  %v3632_v48 = vld [vmem:[#allocation8 + $0x28] sm:$0xff]  }
 0x1e6   : > { %v1539_v51 = vadd.f32 %v3241_v32, %v3057_v47  ;;  %v3618_v32 = vld [vmem:[#allocation7 + $0xa0] sm:$0xff]   ;;  %v3634_v50 = vld [vmem:[#allocation8 + $0x30] sm:$0xff]  }
 0x1e7   : > { %v3631_v47 = vld [vmem:[#allocation8 + $0x60] sm:$0xff]  }
 0x1e8   : > { %v1546_v52 = vrot.slane %v1539_v51, 3  ;;  %v3635_v51 = vld [vmem:[#allocation8 + $0x70] sm:$0xff]  }
 0x1ea   : > { %v1548_v53 = vsel %vm1547_vm3, %v1545_v43, %v1546_v52  ;;  %v3627_v43 = vld [vmem:[#allocation8 + $0x50] sm:$0xff]   ;;  %v3636_v52 = vld [vmem:[#allocation8 + $0x38] sm:$0xff]  }
 0x1eb   : > { %v1551_v54 = vadd.f32 %v1548_v53, %v1254_v24  ;;  %v3614_v24 = vld [vmem:[#allocation7 + $0x80] sm:$0xff]   ;;  %v3637_v53 = vld [vmem:[#allocation8 + $0x78] sm:$0xff]  }
 0x1fa   : > { %v3087_v55 = vpop.f32.mrb[32].mxu0 }
 0x1fb   : > { %v3088_v26 = vpop.f32.mrb[33].mxu0 }
 0x1fc   : > { %v3089_v56 = vadd.f32 %v3088_v26, %v3087_v55  ;;  %v3090_v30 = vpop.f32.mrb[34].mxu0  ;;  %v3261_v57 = vpop.f32.mrb[16].mxu1 }
 0x1fd   : > { %v3091_v25 = vpop.f32.mrb[35].mxu0  ;;  %v1827_v58 = vpop.f32.mrb[17].mxu1 }
 0x1fe   : > { %v3092_v59 = vadd.f32 %v3091_v25, %v3090_v30  ;;  %v1828_v60 = vadd.f32 %v3089_v56, %v1827_v58  ;;  %v3262_v61 = vpop.f32.mrb[18].mxu1 }
 0x1ff   : > { %v1830_v62 = vpop.f32.mrb[19].mxu1 }
 0x200   : > { %v1831_v22 = vadd.f32 %v3092_v59, %v1830_v62  ;;  %v1841_v63 = vrot.slane %v1828_v60, 4 }
 0x202   : > { %v1842_v0 = vrot.slane %v1831_v22, 4  ;;  %v3093_v1 = vpop.f32.mrb[36].mxu0 }
 0x203   : > { %v3094_v2 = vpop.f32.mrb[37].mxu0 }
 0x204   : > { %v1846_v3 = vsel %vm1844_vm4, %v1841_v63, %v1842_v0  ;;  %v3095_v5 = vadd.f32 %v3094_v2, %v3093_v1  ;;  %v3096_v6 = vpop.f32.mrb[38].mxu0 }
 0x205   : > { %v1847_v7 = vadd.f32 %v1846_v3, %v1550_v49  ;;  %v3097_v8 = vpop.f32.mrb[39].mxu0  ;;  %v3633_v49 = vld [vmem:[#allocation8 + $0x68] sm:$0xff]  }
 0x206   : > { %v1836_v9 = vadd.f32 %v3261_v57, %v3095_v5 }
 0x207   : > { %v1856_v10 = vadd.f32 %v2857_v4, %v1847_v7  ;;  %v2884_v7 = vld [vmem:[%s4339_s4] ss:$0 sm:$0xff] }
 0x208   : > { %v1843_v12 = vrot.slane %v1836_v9, 4 }
 0x209   : > { %v1860_v13 = vmul.f32 1.442695, %v1856_v10  ;;  %vm1858_vm5 = vcmp.gt.f32.partialorder %v1856_v10, 0.0 }
 0x20a   : > { %v1845_v14 = vsel %vm1844_vm4, %v1842_v0, %v1843_v12 }
 0x20b   : > { %v1848_v15 = vadd.f32 %v1845_v14, %v1551_v54  ;;  %3646 = vpow2.f32 %v1860_v13 }
 0x20d   : > { %v1857_v16 = vadd.f32 %v2857_v4, %v1848_v15 }
 0x20f   : > { %v1862_v34 = vmul.f32 1.442695, %v1857_v16  ;;  %vm1859_vm6 = vcmp.gt.f32.partialorder %v1857_v16, 0.0 }
 0x211   : > { %3648 = vpow2.f32 %v1862_v34 }
 0x215   : > { %v3647_v37 = vpop.eup %3646 }
 0x216   : > { %v2858_v18 = vadd.f32 -1.0, %v3647_v37 }
 0x218   : > { %v4207_v21 = vsel %vm1858_vm5, %v1856_v10, %v2858_v18 }
 0x21b   : > { %v3649_v19 = vpop.eup %3648 }
 0x21c   : > { %v2859_v20 = vadd.f32 -1.0, %v3649_v19 }
 0x21e   : > { %v4209_v23 = vsel %vm1859_vm6, %v1857_v16, %v2859_v20 }
 0x21f   : > { %v1868_v27 = vpack.c.bf16 %v4209_v23, %v4207_v21 }
 0x221   : > { %3280 = vmatmul.mubr.bf16.vlgmr.msra.gmra.mrb[40].mxu0 %v1868_v27  ;;  %3300 = vmatmul.mubr.bf16.vlgmr.msra.gmra.mrb[20].mxu1 %v1868_v27 }
 0x222   : > { %3304 = vmatpush3.bf16.msra.mxu0 %v3614_v24  ;;  %3319 = vmatprep.mubr.msk.bf16.mxu0 %vm3863_vm1, %v3862_v17 }
 0x223   : > { %3305 = vmatprep.subr.bf16.mxu0 %v3862_v17  ;;  %3339 = vmatprep.mubr.msk.bf16.mxu1 %vm3863_vm1, %v3862_v17 }
 0x224   : > { %3324 = vmatpush3.bf16.msra.mxu1 %v3622_v38  ;;  %v3644_v38 = vld [vmem:[#allocation8 + $0xb0] sm:$0xff]  }
 0x225   : > { %3325 = vmatprep.subr.bf16.mxu1 %v3862_v17 }
 0x226   : > { %3306 = vmatpush3.bf16.msra.mxu0 %v3615_v28  ;;  %v3638_v28 = vld [vmem:[#allocation8 + $0x80] sm:$0xff]  }
 0x227   : > { %3307 = vmatprep.subr.bf16.mxu0 %v3862_v17 }
 0x228   : > { %3326 = vmatpush3.bf16.msra.mxu1 %v3624_v40 }
 0x229   : > { %3327 = vmatprep.subr.bf16.mxu1 %v3862_v17 }
 0x22a   : > { %3308 = vmatpush3.bf16.msra.mxu0 %v3616_v29 }
 0x22b   : > { %3309 = vmatprep.subr.bf16.mxu0 %v3862_v17 }
 0x22c   : > { %3328 = vmatpush3.bf16.msra.mxu1 %v3626_v42 }
 0x22d   : > { %3329 = vmatprep.subr.bf16.mxu1 %v3862_v17 }
 0x22e   : > { %3310 = vmatpush3.bf16.msra.mxu0 %v3617_v31  ;;  %v3639_v31 = vld [vmem:[#allocation8 + $0x88] sm:$0xff]  }
 0x22f   : > { %3311 = vmatprep.subr.bf16.mxu0 %v3862_v17 }
 0x230   : > { %3330 = vmatpush3.bf16.msra.mxu1 %v3628_v44 }
 0x231   : > { %3331 = vmatprep.subr.bf16.mxu1 %v3862_v17 }
 0x232   : > { %3312 = vmatpush3.bf16.msra.mxu0 %v3618_v32  ;;  %v3640_v32 = vld [vmem:[#allocation8 + $0x90] sm:$0xff]  }
 0x233   : > { %3313 = vmatprep.subr.bf16.mxu0 %v3862_v17 }
 0x234   : > { %3332 = vmatpush3.bf16.msra.mxu1 %v3630_v46 }
 0x235   : > { %3333 = vmatprep.subr.bf16.mxu1 %v3862_v17 }
 0x236   : > { %3314 = vmatpush3.bf16.msra.mxu0 %v3619_v33  ;;  %v3641_v33 = vld [vmem:[#allocation8 + $0x98] sm:$0xff]  }
 0x237   : > { %3315 = vmatprep.subr.bf16.mxu0 %v3862_v17 }
 0x238   : > { %3334 = vmatpush3.bf16.msra.mxu1 %v3632_v48 }
 0x239   : > { %3335 = vmatprep.subr.bf16.mxu1 %v3862_v17 }
 0x23a   : > { %3316 = vmatpush3.bf16.msra.mxu0 %v3620_v35  ;;  %v3642_v35 = vld [vmem:[#allocation8 + $0xa0] sm:$0xff]  }
 0x23b   : > { %3317 = vmatprep.subr.bf16.mxu0 %v3862_v17 }
 0x23c   : > { %3336 = vmatpush3.bf16.msra.mxu1 %v3634_v50 }
 0x23d   : > { %3337 = vmatprep.subr.bf16.mxu1 %v3862_v17 }
 0x23e   : > { %3318 = vmatpush3.bf16.msra.mxu0 %v3621_v36  ;;  %v3643_v36 = vld [vmem:[#allocation8 + $0xa8] sm:$0xff]  }
 0x23f   : > { %3343 = vmatprep.subr.bf16.mxu0 %v3862_v17 }
 0x240   : > { %3338 = vmatpush3.bf16.msra.mxu1 %v3636_v52 }
 0x241   : > { %3320 = vmatmul.mubr.bf16.vlgmr.msra.gmra.mrb[44].mxu0 %v1868_v27  ;;  %3363 = vmatprep.subr.bf16.mxu1 %v3862_v17 }
 0x242   : > { %3359 = vmatprep.mubr.msk.bf16.mxu0 %vm3863_vm1, %v3862_v17  ;;  %3344 = vmatpush3.bf16.msra.mxu0 %v3623_v39  ;;  %v3645_v39 = vld [vmem:[#allocation8 + $0xb8] sm:$0xff]  }
 0x243   : > { %3345 = vmatprep.subr.bf16.mxu0 %v3862_v17 }
 0x246   : > { %3346 = vmatpush3.bf16.msra.mxu0 %v3625_v41 }
 0x247   : > { %3347 = vmatprep.subr.bf16.mxu0 %v3862_v17 }
 0x24a   : > { %3348 = vmatpush3.bf16.msra.mxu0 %v3627_v43 }
 0x24b   : > { %3349 = vmatprep.subr.bf16.mxu0 %v3862_v17 }
 0x24e   : > { %3350 = vmatpush3.bf16.msra.mxu0 %v3629_v45 }
 0x24f   : > { %3351 = vmatprep.subr.bf16.mxu0 %v3862_v17 }
 0x252   : > { %3352 = vmatpush3.bf16.msra.mxu0 %v3631_v47 }
 0x253   : > { %3353 = vmatprep.subr.bf16.mxu0 %v3862_v17 }
 0x256   : > { %3354 = vmatpush3.bf16.msra.mxu0 %v3633_v49 }
 0x257   : > { %3355 = vmatprep.subr.bf16.mxu0 %v3862_v17 }
 0x25a   : > { %3356 = vmatpush3.bf16.msra.mxu0 %v3635_v51 }
 0x25b   : > { %3357 = vmatprep.subr.bf16.mxu0 %v3862_v17 }
 0x25e   : > { %3358 = vmatpush3.bf16.msra.mxu0 %v3637_v53 }
 0x2f4   : > { %v1967_v54 = vpop.f32.mrb[40].mxu0  ;;  %v2083_v55 = vpop.f32.mrb[20].mxu1 }
 0x2f5   : > { %v3281_v26 = vpop.f32.mrb[41].mxu0  ;;  %v3301_v56 = vpop.f32.mrb[21].mxu1  ;;  %v1976_v25 = vrot.slane %v1967_v54, 6  ;;  %v2092_v58 = vrot.slane %v2083_v55, 7 }
 0x2f6   : > { %v1970_v30 = vpop.f32.mrb[42].mxu0  ;;  %v2086_v57 = vpop.f32.mrb[22].mxu1 }
 0x2f7   : > { %v1977_v59 = vrot.slane %v1970_v30, 6  ;;  %v2093_v60 = vrot.slane %v2086_v57, 7  ;;  %v3282_v61 = vpop.f32.mrb[43].mxu0  ;;  %v3302_v62 = vpop.f32.mrb[23].mxu1 }
 0x2f9   : > { %v1979_v22 = vsel %vm1974_vm7, %v1977_v59, %v1976_v25  ;;  %v2095_v63 = vsel %vm2090_vm8, %v2093_v60, %v2092_v58  ;;  %v1978_v0 = vsel %vm1974_vm7, %v1976_v25, %v1977_v59  ;;  %v2094_v1 = vsel %vm2090_vm8, %v2092_v58, %v2093_v60  ;;  %v2911_v25 = vld [vmem:[%s4341_s6] ss:$0 sm:$0xff] }
 0x2fa   : > { %v1980_v2 = vsel %vm1974_vm7, 0.0, %v1979_v22  ;;  %v2096_v3 = vsel %vm2090_vm8, 0.0, %v2095_v63  ;;  %v2099_v4 = vadd.f32 %v2094_v1, %v1978_v0 }
 0x2fb   : > { %v2098_v5 = vadd.f32 %v2096_v3, %v1980_v2 }
 0x314   : > { %v2199_v6 = vpop.f32.mrb[44].mxu0 }
 0x315   : > { %v2206_v8 = vadd.f32 %v2199_v6, %v2098_v5  ;;  %v3321_v9 = vpop.f32.mrb[45].mxu0 }
 0x316   : > { %v2202_v10 = vpop.f32.mrb[46].mxu0 }
 0x317   : > { %v2215_v12 = vadd.f32 %v2884_v7, %v2206_v8  ;;  %v2207_v13 = vadd.f32 %v2202_v10, %v2099_v4  ;;  %v3322_v14 = vpop.f32.mrb[47].mxu0 }
 0x319   : > { %v2219_v15 = vmul.f32 1.442695, %v2215_v12  ;;  %v2216_v16 = vadd.f32 %v2884_v7, %v2207_v13  ;;  %vm2217_vm9 = vcmp.gt.f32.partialorder %v2215_v12, 0.0  ;;  %v349_v13 = vadd.s32 8, %v4172_v11 }
 0x31b   : > { %3650 = vpow2.f32 %v2219_v15  ;;  %v2221_v34 = vmul.f32 1.442695, %v2216_v16  ;;  %vm2218_vm10 = vcmp.gt.f32.partialorder %v2216_v16, 0.0  ;;  %vm2595_vm13 = vcmp.lt.s32.totalorder %v349_v13, 12 }
 0x31d   : > { %3652 = vpow2.f32 %v2221_v34 }
 0x325   : > { %v3651_v37 = vpop.eup %3650 }
 0x326   : > { %v2885_v18 = vadd.f32 -1.0, %v3651_v37 }
 0x327   : > { %v3653_v19 = vpop.eup %3652 }
 0x328   : > { %v2886_v20 = vadd.f32 -1.0, %v3653_v19  ;;  %v2225_v24 = vsel %vm2217_vm9, %v2215_v12, %v2885_v18 }
 0x32a   : > { %v2226_v27 = vsel %vm2218_vm10, %v2216_v16, %v2886_v20 }
 0x32b   : > { %v2227_v29 = vpack.c.bf16 %v2226_v27, %v2225_v24 }
 0x32d   : > { %3340 = vmatmul.mubr.bf16.vlgmr.msra.gmra.mrb[24].mxu1 %v2227_v29  ;;  %3360 = vmatmul.mubr.bf16.vlgmr.msra.gmra.mrb[48].mxu0 %v2227_v29 }
 0x32e   : > { %3364 = vmatpush3.bf16.msra.mxu1 %v3638_v28  ;;  %3379 = vmatprep.mubr.msk.bf16.mxu1 %vm3863_vm1, %v3862_v17 }
 0x32f   : > { %3365 = vmatprep.subr.bf16.mxu1 %v3862_v17 }
 0x332   : > { %3366 = vmatpush3.bf16.msra.mxu1 %v3639_v31 }
 0x333   : > { %3367 = vmatprep.subr.bf16.mxu1 %v3862_v17 }
 0x336   : > { %3368 = vmatpush3.bf16.msra.mxu1 %v3640_v32 }
 0x337   : > { %3369 = vmatprep.subr.bf16.mxu1 %v3862_v17 }
 0x33a   : > { %3370 = vmatpush3.bf16.msra.mxu1 %v3641_v33 }
 0x33b   : > { %3371 = vmatprep.subr.bf16.mxu1 %v3862_v17 }
 0x33e   : > { %3372 = vmatpush3.bf16.msra.mxu1 %v3642_v35 }
 0x33f   : > { %3373 = vmatprep.subr.bf16.mxu1 %v3862_v17 }
 0x342   : > { %3374 = vmatpush3.bf16.msra.mxu1 %v3643_v36 }
 0x343   : > { %3375 = vmatprep.subr.bf16.mxu1 %v3862_v17 }
 0x346   : > { %3376 = vmatpush3.bf16.msra.mxu1 %v3644_v38 }
 0x347   : > { %3377 = vmatprep.subr.bf16.mxu1 %v3862_v17 }
 0x34a   : > { %3378 = vmatpush3.bf16.msra.mxu1 %v3645_v39 }
 0x34d   : > { %3380 = vmatmul.mubr.bf16.vlgmr.msra.gmra.mrb[28].mxu1 %v2227_v29 }
 0x400   : > { %v2326_v40 = vpop.f32.mrb[24].mxu1  ;;  %v2440_v41 = vpop.f32.mrb[48].mxu0 }
 0x401   : > { %v3341_v42 = vpop.f32.mrb[25].mxu1  ;;  %v3361_v43 = vpop.f32.mrb[49].mxu0  ;;  %v2333_v46 = vrot.slane %v2326_v40, 6  ;;  %v2447_v47 = vrot.slane %v2440_v41, 7 }
 0x402   : > { %v2329_v44 = vpop.f32.mrb[26].mxu1  ;;  %v2443_v45 = vpop.f32.mrb[50].mxu0 }
 0x403   : > { %v2334_v48 = vrot.slane %v2329_v44, 6  ;;  %v2448_v49 = vrot.slane %v2443_v45, 7  ;;  %v3342_v50 = vpop.f32.mrb[27].mxu1  ;;  %v3362_v51 = vpop.f32.mrb[51].mxu0 }
 0x405   : > { %v2336_v52 = vsel %vm1974_vm7, %v2334_v48, %v2333_v46  ;;  %v2450_v17 = vsel %vm2090_vm8, %v2448_v49, %v2447_v47  ;;  %v2335_v53 = vsel %vm1974_vm7, %v2333_v46, %v2334_v48  ;;  %v2449_v54 = vsel %vm2090_vm8, %v2447_v47, %v2448_v49 }
 0x406   : > { %v2337_v55 = vsel %vm1974_vm7, 0.0, %v2336_v52  ;;  %v2451_v26 = vsel %vm2090_vm8, 0.0, %v2450_v17  ;;  %v2454_v56 = vadd.f32 %v2449_v54, %v2335_v53 }
 0x407   : > { %v2453_v30 = vadd.f32 %v2451_v26, %v2337_v55 }
 0x420   : > { %v2554_v57 = vpop.f32.mrb[28].mxu1 }
 0x421   : > { %v2561_v58 = vadd.f32 %v2554_v57, %v2453_v30  ;;  %v3381_v59 = vpop.f32.mrb[29].mxu1 }
 0x422   : > { %v2557_v60 = vpop.f32.mrb[30].mxu1 }
 0x423   : > { %v2570_v61 = vadd.f32 %v2911_v25, %v2561_v58  ;;  %v2562_v62 = vadd.f32 %v2557_v60, %v2454_v56  ;;  %v3382_v22 = vpop.f32.mrb[31].mxu1 }
 0x425   : > { %v2574_v63 = vmul.f32 1.442695, %v2570_v61  ;;  %v2571_v0 = vadd.f32 %v2911_v25, %v2562_v62  ;;  %vm2572_vm11 = vcmp.gt.f32.partialorder %v2570_v61, 0.0 }
 0x427   : > { %3654 = vpow2.f32 %v2574_v63  ;;  %v2576_v1 = vmul.f32 1.442695, %v2571_v0  ;;  %vm2573_vm12 = vcmp.gt.f32.partialorder %v2571_v0, 0.0 }
 0x429   : > { %3656 = vpow2.f32 %v2576_v1 }
 0x431   : > { %v3655_v2 = vpop.eup %3654 }
 0x432   : > { %v2912_v3 = vadd.f32 -1.0, %v3655_v2 }
 0x433   : > { %v3657_v4 = vpop.eup %3656 }
 0x434   : > { %v2913_v5 = vadd.f32 -1.0, %v3657_v4  ;;  %v2580_v6 = vsel %vm2572_vm11, %v2570_v61, %v2912_v3 }
 0x435   : > { %v2582_v7 = vadd.f32 %v2580_v6, %v4207_v21 }
 0x436   : > { %v2581_v8 = vsel %vm2573_vm12, %v2571_v0, %v2913_v5 }
 0x437   : > { %v2583_v9 = vadd.f32 %v2581_v8, %v4209_v23  ;;  %v2586_v10 = vmul.f32 1.442695, %v2582_v7  ;;  %vm2584_vm15 = vcmp.gt.f32.partialorder %v2582_v7, 0.0 }
 0x439   : > { %3658 = vpow2.f32 %v2586_v10  ;;  %v2588_v12 = vmul.f32 1.442695, %v2583_v9  ;;  %vm2585_vm14 = vcmp.gt.f32.partialorder %v2583_v9, 0.0 }
 0x43b   : > { %3660 = vpow2.f32 %v2588_v12 }
 0x443   : > { %v3659_v14 = vpop.eup %3658 }
 0x444   : > { %v2914_v16 = vadd.f32 -1.0, %v3659_v14 }
 0x445   : > { %v3661_v15 = vpop.eup %3660 }
 0x446   : > { %v2915_v34 = vadd.f32 -1.0, %v3661_v15  ;;  %v2592_v21 = vsel %vm2584_vm15, %v2582_v7, %v2914_v16 }
 0x448   : > { %v2593_v37 = vsel %vm2585_vm14, %v2583_v9, %v2915_v34 }
 0x449   : > { %v2597_v18 = vsel %vm2595_vm13, %v2593_v37, 0.0 }
 0x44a   : > { %v2598_v19 = vadd.f32 %v2597_v18, %v2592_v21 }
 0x44c   : > { %2599 = vadd.xlane.f32.xlu0 %v2598_v19 }
 0x4d9   : > { %v2600_v23 = vpop.xlane.xlu0 %2599 }
 0x4da   : > { %v2601_v20 = vrot.slane %v2600_v23, 4 }
 0x4dc   : > { %v2602_v24 = vadd.f32 %v2601_v20, %v2600_v23 }
 0x4de   : > { %v2603_v27 = vrot.slane %v2602_v24, 2 }
 0x4e0   : > { %v2604_v11 = vadd.f32 %v2603_v27, %v2602_v24 }
 0x4e2   : > { %v2605_v28 = vrot.slane %v2604_v11, 1 }
 0x4e4   : > { %v2606_v29 = vadd.f32 %v2605_v28, %v2604_v11 }
 0x4e6   : > { %3386 = vpush %v2606_v29 }
 0x517   : > { %s3387_s8 = spop %3386 }
 0x518   : > { %s2608_s17 = smul.f32 0.0006510417, %s3387_s8 }
 0x51a   : > { %v2609_v31 = vstv %s2608_s17 }
 0x51b   : > { %2611 = vst [vmem:[%s339_s16] sm:$0x1] %v2609_v31 }
 0x51c   : > { %3791 = shalt.err (!%p3788_p4)
}
 0x51d   : > { %s3792_s21 = scalar_lea.hbm %s4291_s20, 16  ;;  %s3796_s16 = scalar_lea.hbm %s4342_s7, 32 }
 0x51e   : > { %p3793_p9 = scmp.ne.s32.totalorder %s4291_s20, %s3792_s21  ;;  %p3797_p8 = scmp.lt.u32.totalorder %s4291_s20, %s4342_s7 }
 0x51f   : > { %p3798_p13 = scmp.lt.u32.totalorder %s3796_s16, %s3792_s21  ;;  %p3800_p10 = scmp.lt.u32.totalorder %s3792_s21, %s4291_s20 }
 0x520   : > { %p3794_p0 = pnand %p3793_p9, %p4059_p5 }
 0x521   : > { %p3799_p6 = por %p3798_p13, %p3797_p8 }
 0x522   : > { %p3795_p11 = pneg %p3794_p0 }
 0x523   : > { %p3801_p3 = por %p3800_p10, %p3799_p6 }
 0x525   : > { %p3802_p7 = pnand %p3801_p3, %p3795_p11 }
 0x527   : > { %3805 = shalt.err (!%p3802_p7)
}
 0x528   : > { %3402 = dma.vmem_to_hbm [thread:$0]  (%p4059_p5), %s4293_s10, 16, %s4291_s20, %s2613_s30  }
 0x529 PF: > { %s4362_s17 = sld [smem:[#allocation15_spill]]  ;;  %s2637_s13 = sand.u32 1, %s3840_s24  }
 0x52a   : > { %p4364_p1 = scmp.ge.s32.totalorder %s3852_s27, 2  ;;  %s2638_s15 = scalar_lea.sflag [#allocation4], %s2637_s13 }
 0x52f   : > { %p4363_p12 = scmp.ne.s32.totalorder %s4362_s17, 0 }
 0x531   : > { %p3419_p2 = pnand %p4364_p1, %p4363_p12 }
 0x533   : > { %3835 = dma.done.wait (!%p3419_p2), %s2638_s15, 16  }
 0x534   : > { %3837 = vsyncadd (!%p3419_p2), %s2638_s15, 4294967280  ;;  %p22_p4 = scmp.ge.s32.totalorder %s4045_s22, 4   ;;  %s4365_s24 = smov %s3844_s25 }
 0x535   : > { %s4366_s25 = smov %s3848_s26  ;;  %s4367_s26 = smov %s4055_s18 }
 0x536   : > { %s4368_s27 = smov %s4045_s22  ;;  %24 = sbr.rel (!%p22_p4) target bundleno = 7 (0x7), region = 113 }
 0x53d   :  { %2642 = vsyncpa [#allocation3], 1 }
 0x53e   :  { %2644 = vsyncpa [#allocation3 + $0x1], 1 }
 0x53f   :  { %2645 = vsyncpa [#allocation6], 1 }
 0x540   :  { %2646 = vsyncpa [#allocation9], 1 }
 0x541   :  { %2647 = vsyncpa [#allocation4], 1 }
 0x542   :  { %2649 = vsyncpa [#allocation4 + $0x1], 1 }

</bundles_post_ra>
